<compile_context>
chip_gen: v7x
topology: tpu7x:2x2x1
jax: 0.10.0
libtpu: 0.0.40
codegen_flags: <defaults>
</compile_context>

<pallas_src>
import functools

import numpy as np

import jax
import jax.numpy as jnp
from jax import lax
from jax.experimental import pallas as pl
from jax.experimental.pallas import tpu as pltpu

EPS = 1e-5


# --------------------------------------------------------------------------------------
# In-kernel helpers
# --------------------------------------------------------------------------------------
def _lane_group_sum(v, C, W):
    """v: (1, W*C). Returns (1, W*C) where each lane holds the sum over its channel
    group (sum over w of lane w*C + c), replicated back to every w position.
    Uses circular lane rolls, so the roll direction is irrelevant."""
    if W == 1:
        return v
    if (W & (W - 1)) == 0:                       # power of two -> log2(W) tree
        step = 1
        while step < W:
            v = v + pltpu.roll(v, step * C, axis=1)
            step *= 2
        return v
    acc = v                                      # general W: linear accumulation
    for k in range(1, W):
        acc = acc + pltpu.roll(v, k * C, axis=1)
    return acc


def _bn_lane_dense(y, gamma_l, beta_l, *, C, W, count, relu):
    """Training-mode BatchNorm on a lane-dense (rows, W*C) activation.
    gamma_l / beta_l are already tiled to (1, W*C). Single-pass statistics."""
    s1 = jnp.sum(y, axis=0, keepdims=True)       # (1, W*C)
    s2 = jnp.sum(y * y, axis=0, keepdims=True)   # (1, W*C)   same traversal
    s1 = _lane_group_sum(s1, C, W)               # per-channel sums, lane-replicated
    s2 = _lane_group_sum(s2, C, W)
    inv_n = 1.0 / count
    mean = s1 * inv_n
    var = s2 * inv_n - mean * mean               # biased variance (PyTorch training BN)
    scale = gamma_l * lax.rsqrt(var + EPS)
    shift = beta_l - mean * scale
    out = y * scale + shift
    return jnp.maximum(out, 0.0) if relu else out


def resblock_kernel(x_ref,
                    m1_ref, b1_ref, g1_ref, be1_ref,
                    m2_ref, b2_ref, g2_ref, be2_ref,
                    mt_ref, bt_ref, gt_ref, bet_ref,
                    o_ref,
                    *, N, H, W, Cin, Cout):
    del Cin  # (only the banded-matrix shapes depend on it)
    NH = N * H
    WCo = W * Cout
    count = float(N * H * W)

    x = x_ref[...]                               # (N*H, W*Cin), lane-folded channels

    # h position of each merged row; masks handle both the image border and the
    # batch boundaries after the circular row roll.
    h_idx = lax.broadcasted_iota(jnp.int32, (NH, WCo), 0) % H
    not_top = h_idx != 0          # rows allowed to receive a contribution from row h-1
    not_bot = h_idx != (H - 1)    # rows allowed to receive a contribution from row h+1

    def conv3x3(inp, m_ref, bias_lane):
        # One matmul per kh tap; kw taps + width zero-padding live inside the banded
        # weight matrices -> no per-tap slicing of the activation, no padded scratch.
        p0 = jnp.dot(inp, m_ref[0], preferred_element_type=jnp.float32)
        p1 = jnp.dot(inp, m_ref[1], preferred_element_type=jnp.float32)
        p2 = jnp.dot(inp, m_ref[2], preferred_element_type=jnp.float32)
        acc = p1 + bias_lane
        # kh = 0 tap: output row h reads input row h-1 (circular roll + border mask).
        acc = acc + jnp.where(not_top, jnp.roll(p0, 1, axis=0), 0.0)
        # kh = 2 tap: output row h reads input row h+1.
        acc = acc + jnp.where(not_bot, jnp.roll(p2, -1, axis=0), 0.0)
        return acc

    # conv1 -> bn1 -> relu1
    y = conv3x3(x, m1_ref, b1_ref[...])
    y = _bn_lane_dense(y, g1_ref[...], be1_ref[...], C=Cout, W=W, count=count, relu=True)

    # conv2 -> bn2
    y = conv3x3(y, m2_ref, b2_ref[...])
    y = _bn_lane_dense(y, g2_ref[...], be2_ref[...], C=Cout, W=W, count=count, relu=False)

    # shortcut: conv1x1 -> bn  (block-diagonal weight keeps it lane-dense)
    t = jnp.dot(x, mt_ref[...], preferred_element_type=jnp.float32) + bt_ref[...]
    t = _bn_lane_dense(t, gt_ref[...], bet_ref[...], C=Cout, W=W, count=count, relu=False)

    # residual add + relu2; single full-width unmasked store.
    o_ref[...] = jnp.maximum(y + t, 0.0)


# --------------------------------------------------------------------------------------
# Wrapper
# --------------------------------------------------------------------------------------
def _banded_conv_weights(w_hwio, W):
    """(KH, KW, Ci, Co) -> (KH, W*Ci, W*Co). The kw taps and the padding=1 zero padding
    along the width are encoded in the band structure of each per-kh matrix."""
    KH, KW, Ci, Co = w_hwio.shape
    sel = np.zeros((KW, W, W), np.float32)
    for kw in range(KW):
        for w_out in range(W):
            w_in = w_out + kw - 1
            if 0 <= w_in < W:
                sel[kw, w_in, w_out] = 1.0
    m = jnp.einsum('kio,hkcd->hicod', jnp.asarray(sel), w_hwio)   # (KH, W, Ci, W, Co)
    return m.reshape(KH, W * Ci, W * Co)


def resblock_pallas(x_nchw, params):
    (w1, b1, g1, be1, w2, b2, g2, be2, wt, bt, gt, bet) = params
    N, Cin, H, W = x_nchw.shape
    Cout = w1.shape[0]
    f32 = jnp.float32

    # NCHW -> (N*H, W*Cin): channels folded onto the lane axis (lane-dense when W*C>=128).
    # TODO(synk): a full model should keep activations in this layout between blocks
    # instead of round-tripping through NCHW around every ResBlock.
    x_rows = jnp.transpose(x_nchw, (0, 2, 3, 1)).astype(f32).reshape(N * H, W * Cin)

    # OIHW -> HWIO / IO, then fold kw taps + width padding into banded matrices.
    w1_hwio = jnp.transpose(w1, (2, 3, 1, 0)).astype(f32)
    w2_hwio = jnp.transpose(w2, (2, 3, 1, 0)).astype(f32)
    wt_io = jnp.transpose(wt[:, :, 0, 0], (1, 0)).astype(f32)

    m1 = _banded_conv_weights(w1_hwio, W)                          # (3, W*Cin,  W*Cout)
    m2 = _banded_conv_weights(w2_hwio, W)                          # (3, W*Cout, W*Cout)
    mt = jnp.einsum('io,cd->icod', jnp.eye(W, dtype=f32), wt_io)   # block-diag 1x1 conv
    mt = mt.reshape(W * Cin, W * Cout)

    # Per-channel vectors pre-tiled to the (w, c) lane layout: (1, W*Cout).
    lane = lambda v: jnp.tile(v.reshape(1, Cout).astype(f32), (1, W))

    inputs = (
        x_rows,
        m1, lane(b1), lane(g1), lane(be1),
        m2, lane(b2), lane(g2), lane(be2),
        mt, lane(bt), lane(gt), lane(bet),
    )

    kernel = functools.partial(resblock_kernel, N=N, H=H, W=W, Cin=Cin, Cout=Cout)
    vmem = pl.BlockSpec(memory_space=pltpu.MemorySpace.VMEM)

    out = pl.pallas_call(
        kernel,
        out_shape=jax.ShapeDtypeStruct((N * H, W * Cout), f32),
        in_specs=[vmem] * len(inputs),
        out_specs=vmem,
        compiler_params=pltpu.CompilerParams(vmem_limit_bytes=32 * 1024 * 1024),
    )(*inputs)

    # (N*H, W*Cout) -> NCHW
    return jnp.transpose(out.reshape(N, H, W, Cout), (0, 3, 1, 2))


# --------------------------------------------------------------------------------------
# Pure-JAX reference (sanity check)
# --------------------------------------------------------------------------------------
def _bn_ref(x_nchw, gamma, beta):
    mean = jnp.mean(x_nchw, axis=(0, 2, 3), keepdims=True)
    var = jnp.mean((x_nchw - mean) ** 2, axis=(0, 2, 3), keepdims=True)
    g = gamma.reshape(1, -1, 1, 1)
    b = beta.reshape(1, -1, 1, 1)
    return g * (x_nchw - mean) * lax.rsqrt(var + EPS) + b


def resblock_ref(x_nchw, params):
    (w1, b1, g1, be1, w2, b2, g2, be2, wt, bt, gt, bet) = params
    conv = functools.partial(
        lax.conv_general_dilated,
        dimension_numbers=('NCHW', 'OIHW', 'NCHW'))
    out = conv(x_nchw, w1, window_strides=(1, 1), padding=[(1, 1), (1, 1)])
    out = out + b1.reshape(1, -1, 1, 1)
    out = jnp.maximum(_bn_ref(out, g1, be1), 0.0)
    out = conv(out, w2, window_strides=(1, 1), padding=[(1, 1), (1, 1)])
    out = out + b2.reshape(1, -1, 1, 1)
    out = _bn_ref(out, g2, be2)
    t = conv(x_nchw, wt, window_strides=(1, 1), padding=[(0, 0), (0, 0)])
    t = t + bt.reshape(1, -1, 1, 1)
    t = _bn_ref(t, gt, bet)
    return jnp.maximum(out + t, 0.0)


if __name__ == "__main__":
    key = jax.random.PRNGKey(0)
    N, Cin, Cout, H, W = 2, 4, 8, 16, 16

    ks = jax.random.split(key, 13)
    x = jax.random.normal(ks[0], (N, Cin, H, W), jnp.float32)

    # conv1: (Cout, Cin, 3, 3), conv2: (Cout, Cout, 3, 3), transform: (Cout, Cin, 1, 1)
    w1 = 0.1 * jax.random.normal(ks[1], (Cout, Cin, 3, 3), jnp.float32)
    b1 = 0.1 * jax.random.normal(ks[2], (Cout,), jnp.float32)
    w2 = 0.1 * jax.random.normal(ks[3], (Cout, Cout, 3, 3), jnp.float32)
    b2 = 0.1 * jax.random.normal(ks[4], (Cout,), jnp.float32)
    wt = 0.1 * jax.random.normal(ks[5], (Cout, Cin, 1, 1), jnp.float32)
    bt = 0.1 * jax.random.normal(ks[6], (Cout,), jnp.float32)
    # BatchNorm affine params (PyTorch default init is gamma=1, beta=0; perturb a bit)
    g1 = 1.0 + 0.1 * jax.random.normal(ks[7], (Cout,), jnp.float32)
    be1 = 0.1 * jax.random.normal(ks[8], (Cout,), jnp.float32)
    g2 = 1.0 + 0.1 * jax.random.normal(ks[9], (Cout,), jnp.float32)
    be2 = 0.1 * jax.random.normal(ks[10], (Cout,), jnp.float32)
    gt = 1.0 + 0.1 * jax.random.normal(ks[11], (Cout,), jnp.float32)
    bet = 0.1 * jax.random.normal(ks[12], (Cout,), jnp.float32)

    params = (w1, b1, g1, be1, w2, b2, g2, be2, wt, bt, gt, bet)

    y = resblock_pallas(x, params)
    y = jax.block_until_ready(y)

    y_ref = resblock_ref(x, params)
    assert y.shape == (N, Cout, H, W)
    assert jnp.allclose(y, y_ref, atol=1e-3, rtol=1e-3), \
        f"max err {jnp.max(jnp.abs(y - y_ref))}"

    print("KERNEL_OK")
</pallas_src>

<mosaic_0001>
module attributes {stable_mosaic.version = 11 : i64} {
  func.func @resblock_kernel(%arg0: memref<32x64xf32, #tpu.memory_space<vmem>>, %arg1: memref<3x64x128xf32, #tpu.memory_space<vmem>>, %arg2: memref<1x128xf32, #tpu.memory_space<vmem>>, %arg3: memref<1x128xf32, #tpu.memory_space<vmem>>, %arg4: memref<1x128xf32, #tpu.memory_space<vmem>>, %arg5: memref<3x128x128xf32, #tpu.memory_space<vmem>>, %arg6: memref<1x128xf32, #tpu.memory_space<vmem>>, %arg7: memref<1x128xf32, #tpu.memory_space<vmem>>, %arg8: memref<1x128xf32, #tpu.memory_space<vmem>>, %arg9: memref<64x128xf32, #tpu.memory_space<vmem>>, %arg10: memref<1x128xf32, #tpu.memory_space<vmem>>, %arg11: memref<1x128xf32, #tpu.memory_space<vmem>>, %arg12: memref<1x128xf32, #tpu.memory_space<vmem>>, %arg13: memref<32x128xf32, #tpu.memory_space<vmem>>) attributes {dimension_semantics = [], scalar_prefetch = 0 : i64, scratch_operands = 0 : i64, tpu.core_type = #tpu.core_type<tc>} {
    %c0 = arith.constant 0 : index
    %c0_0 = arith.constant 0 : index
    %0 = vector.load %arg0[%c0, %c0_0] : memref<32x64xf32, #tpu.memory_space<vmem>>, vector<32x64xf32>
    %1 = tpu.iota {dimensions = array<i32: 0>} : vector<32x128xi32>
    %c16_i32 = arith.constant 16 : i32
    %c0_i32 = arith.constant 0 : i32
    %2 = arith.cmpi eq, %c16_i32, %c0_i32 : i32
    %c1_i32 = arith.constant 1 : i32
    %3 = arith.select %2, %c1_i32, %c16_i32 : i32
    %4 = vector.broadcast %3 : i32 to vector<32x128xi32>
    %5 = arith.remsi %1, %4 : vector<32x128xi32>
    %c0_i32_1 = arith.constant 0 : i32
    %6 = vector.broadcast %c0_i32_1 : i32 to vector<32x128xi32>
    %7 = arith.cmpi ne, %5, %6 : vector<32x128xi32>
    %c0_i32_2 = arith.constant 0 : i32
    %8 = vector.broadcast %c0_i32_2 : i32 to vector<32x128xi32>
    %9 = arith.cmpi slt, %5, %8 : vector<32x128xi32>
    %c0_i32_3 = arith.constant 0 : i32
    %10 = arith.cmpi slt, %3, %c0_i32_3 : i32
    %11 = vector.broadcast %10 : i1 to vector<32x128xi1>
    %12 = vector.broadcast %11 : vector<32x128xi1> to vector<32x128xi1>
    %13 = arith.xori %9, %12 : vector<32x128xi1>
    %14 = arith.andi %13, %7 : vector<32x128xi1>
    %15 = vector.broadcast %3 : i32 to vector<32x128xi32>
    %16 = arith.addi %5, %15 : vector<32x128xi32>
    %17 = arith.select %14, %16, %5 : vector<32x128xi1>, vector<32x128xi32>
    %c0_i32_4 = arith.constant 0 : i32
    %18 = vector.broadcast %c0_i32_4 : i32 to vector<32x128xi32>
    %19 = arith.cmpi ne, %17, %18 : vector<32x128xi32>
    %c15_i32 = arith.constant 15 : i32
    %20 = vector.broadcast %c15_i32 : i32 to vector<32x128xi32>
    %21 = arith.cmpi ne, %17, %20 : vector<32x128xi32>
    %c0_5 = arith.constant 0 : index
    %c0_6 = arith.constant 0 : index
    %22 = vector.load %arg2[%c0_5, %c0_6] : memref<1x128xf32, #tpu.memory_space<vmem>>, vector<1x128xf32>
    %c0_7 = arith.constant 0 : index
    %c0_8 = arith.constant 0 : index
    %c0_9 = arith.constant 0 : index
    %23 = vector.load %arg1[%c0_7, %c0_8, %c0_9] : memref<3x64x128xf32, #tpu.memory_space<vmem>>, vector<1x64x128xf32>
    %24 = vector.shape_cast %23 : vector<1x64x128xf32> to vector<64x128xf32>
    %cst = arith.constant dense<0.000000e+00> : vector<32x128xf32>
    %25 = tpu.matmul %0, %24, %cst {dimension_numbers = #tpu.dot_dimension_numbers<[1], [0], [0], [1], [0, 0, 1, 1], [], []>} : vector<32x64xf32>, vector<64x128xf32>, vector<32x128xf32> -> vector<32x128xf32>
    %c1 = arith.constant 1 : index
    %c0_10 = arith.constant 0 : index
    %c0_11 = arith.constant 0 : index
    %26 = vector.load %arg1[%c1, %c0_10, %c0_11] : memref<3x64x128xf32, #tpu.memory_space<vmem>>, vector<1x64x128xf32>
    %27 = vector.shape_cast %26 : vector<1x64x128xf32> to vector<64x128xf32>
    %cst_12 = arith.constant dense<0.000000e+00> : vector<32x128xf32>
    %28 = tpu.matmul %0, %27, %cst_12 {dimension_numbers = #tpu.dot_dimension_numbers<[1], [0], [0], [1], [0, 0, 1, 1], [], []>} : vector<32x64xf32>, vector<64x128xf32>, vector<32x128xf32> -> vector<32x128xf32>
    %c2 = arith.constant 2 : index
    %c0_13 = arith.constant 0 : index
    %c0_14 = arith.constant 0 : index
    %29 = vector.load %arg1[%c2, %c0_13, %c0_14] : memref<3x64x128xf32, #tpu.memory_space<vmem>>, vector<1x64x128xf32>
    %30 = vector.shape_cast %29 : vector<1x64x128xf32> to vector<64x128xf32>
    %cst_15 = arith.constant dense<0.000000e+00> : vector<32x128xf32>
    %31 = tpu.matmul %0, %30, %cst_15 {dimension_numbers = #tpu.dot_dimension_numbers<[1], [0], [0], [1], [0, 0, 1, 1], [], []>} : vector<32x64xf32>, vector<64x128xf32>, vector<32x128xf32> -> vector<32x128xf32>
    %32 = vector.broadcast %22 : vector<1x128xf32> to vector<32x128xf32>
    %33 = arith.addf %28, %32 : vector<32x128xf32>
    %34 = vector.extract_strided_slice %25 {offsets = [31, 0], sizes = [1, 128], strides = [1, 1]} : vector<32x128xf32> to vector<1x128xf32>
    %35 = vector.extract_strided_slice %25 {offsets = [0, 0], sizes = [31, 128], strides = [1, 1]} : vector<32x128xf32> to vector<31x128xf32>
    %36 = tpu.concatenate %34, %35 in 0 : vector<1x128xf32>, vector<31x128xf32> -> vector<32x128xf32>
    %cst_16 = arith.constant 0.000000e+00 : f32
    %37 = vector.broadcast %cst_16 : f32 to vector<32x128xf32>
    %38 = arith.select %19, %36, %37 : vector<32x128xi1>, vector<32x128xf32>
    %39 = arith.addf %33, %38 : vector<32x128xf32>
    %40 = vector.extract_strided_slice %31 {offsets = [1, 0], sizes = [31, 128], strides = [1, 1]} : vector<32x128xf32> to vector<31x128xf32>
    %41 = vector.extract_strided_slice %31 {offsets = [0, 0], sizes = [1, 128], strides = [1, 1]} : vector<32x128xf32> to vector<1x128xf32>
    %42 = tpu.concatenate %40, %41 in 0 : vector<31x128xf32>, vector<1x128xf32> -> vector<32x128xf32>
    %cst_17 = arith.constant 0.000000e+00 : f32
    %43 = vector.broadcast %cst_17 : f32 to vector<32x128xf32>
    %44 = arith.select %21, %42, %43 : vector<32x128xi1>, vector<32x128xf32>
    %45 = arith.addf %39, %44 : vector<32x128xf32>
    %c0_18 = arith.constant 0 : index
    %c0_19 = arith.constant 0 : index
    %46 = vector.load %arg3[%c0_18, %c0_19] : memref<1x128xf32, #tpu.memory_space<vmem>>, vector<1x128xf32>
    %c0_20 = arith.constant 0 : index
    %c0_21 = arith.constant 0 : index
    %47 = vector.load %arg4[%c0_20, %c0_21] : memref<1x128xf32, #tpu.memory_space<vmem>>, vector<1x128xf32>
    %cst_22 = arith.constant dense<0.000000e+00> : vector<128xf32>
    %48 = vector.multi_reduction <add>, %45, %cst_22 [0] : vector<32x128xf32> to vector<128xf32>
    %49 = vector.shape_cast %48 : vector<128xf32> to vector<1x128xf32>
    %50 = arith.mulf %45, %45 : vector<32x128xf32>
    %cst_23 = arith.constant dense<0.000000e+00> : vector<128xf32>
    %51 = vector.multi_reduction <add>, %50, %cst_23 [0] : vector<32x128xf32> to vector<128xf32>
    %52 = vector.shape_cast %51 : vector<128xf32> to vector<1x128xf32>
    %c8_i32 = arith.constant 8 : i32
    %53 = tpu.dynamic_rotate %49 by %c8_i32 dim 1 : vector<1x128xf32>, i32 -> vector<1x128xf32>
    %54 = arith.addf %49, %53 : vector<1x128xf32>
    %c16_i32_24 = arith.constant 16 : i32
    %55 = tpu.dynamic_rotate %54 by %c16_i32_24 dim 1 : vector<1x128xf32>, i32 -> vector<1x128xf32>
    %56 = arith.addf %54, %55 : vector<1x128xf32>
    %c32_i32 = arith.constant 32 : i32
    %57 = tpu.dynamic_rotate %56 by %c32_i32 dim 1 : vector<1x128xf32>, i32 -> vector<1x128xf32>
    %58 = arith.addf %56, %57 : vector<1x128xf32>
    %c64_i32 = arith.constant 64 : i32
    %59 = tpu.dynamic_rotate %58 by %c64_i32 dim 1 : vector<1x128xf32>, i32 -> vector<1x128xf32>
    %60 = arith.addf %58, %59 : vector<1x128xf32>
    %c8_i32_25 = arith.constant 8 : i32
    %61 = tpu.dynamic_rotate %52 by %c8_i32_25 dim 1 : vector<1x128xf32>, i32 -> vector<1x128xf32>
    %62 = arith.addf %52, %61 : vector<1x128xf32>
    %c16_i32_26 = arith.constant 16 : i32
    %63 = tpu.dynamic_rotate %62 by %c16_i32_26 dim 1 : vector<1x128xf32>, i32 -> vector<1x128xf32>
    %64 = arith.addf %62, %63 : vector<1x128xf32>
    %c32_i32_27 = arith.constant 32 : i32
    %65 = tpu.dynamic_rotate %64 by %c32_i32_27 dim 1 : vector<1x128xf32>, i32 -> vector<1x128xf32>
    %66 = arith.addf %64, %65 : vector<1x128xf32>
    %c64_i32_28 = arith.constant 64 : i32
    %67 = tpu.dynamic_rotate %66 by %c64_i32_28 dim 1 : vector<1x128xf32>, i32 -> vector<1x128xf32>
    %68 = arith.addf %66, %67 : vector<1x128xf32>
    %cst_29 = arith.constant 0.001953125 : f32
    %69 = vector.broadcast %cst_29 : f32 to vector<1x128xf32>
    %70 = arith.mulf %60, %69 : vector<1x128xf32>
    %cst_30 = arith.constant 0.001953125 : f32
    %71 = vector.broadcast %cst_30 : f32 to vector<1x128xf32>
    %72 = arith.mulf %68, %71 : vector<1x128xf32>
    %73 = arith.mulf %70, %70 : vector<1x128xf32>
    %74 = arith.subf %72, %73 : vector<1x128xf32>
    %cst_31 = arith.constant 9.99999974E-6 : f32
    %75 = vector.broadcast %cst_31 : f32 to vector<1x128xf32>
    %76 = arith.addf %74, %75 : vector<1x128xf32>
    %77 = math.rsqrt %76 : vector<1x128xf32>
    %78 = arith.mulf %46, %77 : vector<1x128xf32>
    %79 = arith.mulf %70, %78 : vector<1x128xf32>
    %80 = arith.subf %47, %79 : vector<1x128xf32>
    %81 = vector.broadcast %78 : vector<1x128xf32> to vector<32x128xf32>
    %82 = arith.mulf %45, %81 : vector<32x128xf32>
    %83 = vector.broadcast %80 : vector<1x128xf32> to vector<32x128xf32>
    %84 = arith.addf %82, %83 : vector<32x128xf32>
    %cst_32 = arith.constant 0.000000e+00 : f32
    %85 = vector.broadcast %cst_32 : f32 to vector<32x128xf32>
    %86 = arith.maximumf %84, %85 : vector<32x128xf32>
    %c0_33 = arith.constant 0 : index
    %c0_34 = arith.constant 0 : index
    %87 = vector.load %arg6[%c0_33, %c0_34] : memref<1x128xf32, #tpu.memory_space<vmem>>, vector<1x128xf32>
    %c0_35 = arith.constant 0 : index
    %c0_36 = arith.constant 0 : index
    %c0_37 = arith.constant 0 : index
    %88 = vector.load %arg5[%c0_35, %c0_36, %c0_37] : memref<3x128x128xf32, #tpu.memory_space<vmem>>, vector<1x128x128xf32>
    %89 = vector.shape_cast %88 : vector<1x128x128xf32> to vector<128x128xf32>
    %cst_38 = arith.constant dense<0.000000e+00> : vector<32x128xf32>
    %90 = tpu.matmul %86, %89, %cst_38 {dimension_numbers = #tpu.dot_dimension_numbers<[1], [0], [0], [1], [0, 0, 1, 1], [], []>} : vector<32x128xf32>, vector<128x128xf32>, vector<32x128xf32> -> vector<32x128xf32>
    %c1_39 = arith.constant 1 : index
    %c0_40 = arith.constant 0 : index
    %c0_41 = arith.constant 0 : index
    %91 = vector.load %arg5[%c1_39, %c0_40, %c0_41] : memref<3x128x128xf32, #tpu.memory_space<vmem>>, vector<1x128x128xf32>
    %92 = vector.shape_cast %91 : vector<1x128x128xf32> to vector<128x128xf32>
    %cst_42 = arith.constant dense<0.000000e+00> : vector<32x128xf32>
    %93 = tpu.matmul %86, %92, %cst_42 {dimension_numbers = #tpu.dot_dimension_numbers<[1], [0], [0], [1], [0, 0, 1, 1], [], []>} : vector<32x128xf32>, vector<128x128xf32>, vector<32x128xf32> -> vector<32x128xf32>
    %c2_43 = arith.constant 2 : index
    %c0_44 = arith.constant 0 : index
    %c0_45 = arith.constant 0 : index
    %94 = vector.load %arg5[%c2_43, %c0_44, %c0_45] : memref<3x128x128xf32, #tpu.memory_space<vmem>>, vector<1x128x128xf32>
    %95 = vector.shape_cast %94 : vector<1x128x128xf32> to vector<128x128xf32>
    %cst_46 = arith.constant dense<0.000000e+00> : vector<32x128xf32>
    %96 = tpu.matmul %86, %95, %cst_46 {dimension_numbers = #tpu.dot_dimension_numbers<[1], [0], [0], [1], [0, 0, 1, 1], [], []>} : vector<32x128xf32>, vector<128x128xf32>, vector<32x128xf32> -> vector<32x128xf32>
    %97 = vector.broadcast %87 : vector<1x128xf32> to vector<32x128xf32>
    %98 = arith.addf %93, %97 : vector<32x128xf32>
    %99 = vector.extract_strided_slice %90 {offsets = [31, 0], sizes = [1, 128], strides = [1, 1]} : vector<32x128xf32> to vector<1x128xf32>
    %100 = vector.extract_strided_slice %90 {offsets = [0, 0], sizes = [31, 128], strides = [1, 1]} : vector<32x128xf32> to vector<31x128xf32>
    %101 = tpu.concatenate %99, %100 in 0 : vector<1x128xf32>, vector<31x128xf32> -> vector<32x128xf32>
    %cst_47 = arith.constant 0.000000e+00 : f32
    %102 = vector.broadcast %cst_47 : f32 to vector<32x128xf32>
    %103 = arith.select %19, %101, %102 : vector<32x128xi1>, vector<32x128xf32>
    %104 = arith.addf %98, %103 : vector<32x128xf32>
    %105 = vector.extract_strided_slice %96 {offsets = [1, 0], sizes = [31, 128], strides = [1, 1]} : vector<32x128xf32> to vector<31x128xf32>
    %106 = vector.extract_strided_slice %96 {offsets = [0, 0], sizes = [1, 128], strides = [1, 1]} : vector<32x128xf32> to vector<1x128xf32>
    %107 = tpu.concatenate %105, %106 in 0 : vector<31x128xf32>, vector<1x128xf32> -> vector<32x128xf32>
    %cst_48 = arith.constant 0.000000e+00 : f32
    %108 = vector.broadcast %cst_48 : f32 to vector<32x128xf32>
    %109 = arith.select %21, %107, %108 : vector<32x128xi1>, vector<32x128xf32>
    %110 = arith.addf %104, %109 : vector<32x128xf32>
    %c0_49 = arith.constant 0 : index
    %c0_50 = arith.constant 0 : index
    %111 = vector.load %arg7[%c0_49, %c0_50] : memref<1x128xf32, #tpu.memory_space<vmem>>, vector<1x128xf32>
    %c0_51 = arith.constant 0 : index
    %c0_52 = arith.constant 0 : index
    %112 = vector.load %arg8[%c0_51, %c0_52] : memref<1x128xf32, #tpu.memory_space<vmem>>, vector<1x128xf32>
    %cst_53 = arith.constant dense<0.000000e+00> : vector<128xf32>
    %113 = vector.multi_reduction <add>, %110, %cst_53 [0] : vector<32x128xf32> to vector<128xf32>
    %114 = vector.shape_cast %113 : vector<128xf32> to vector<1x128xf32>
    %115 = arith.mulf %110, %110 : vector<32x128xf32>
    %cst_54 = arith.constant dense<0.000000e+00> : vector<128xf32>
    %116 = vector.multi_reduction <add>, %115, %cst_54 [0] : vector<32x128xf32> to vector<128xf32>
    %117 = vector.shape_cast %116 : vector<128xf32> to vector<1x128xf32>
    %c8_i32_55 = arith.constant 8 : i32
    %118 = tpu.dynamic_rotate %114 by %c8_i32_55 dim 1 : vector<1x128xf32>, i32 -> vector<1x128xf32>
    %119 = arith.addf %114, %118 : vector<1x128xf32>
    %c16_i32_56 = arith.constant 16 : i32
    %120 = tpu.dynamic_rotate %119 by %c16_i32_56 dim 1 : vector<1x128xf32>, i32 -> vector<1x128xf32>
    %121 = arith.addf %119, %120 : vector<1x128xf32>
    %c32_i32_57 = arith.constant 32 : i32
    %122 = tpu.dynamic_rotate %121 by %c32_i32_57 dim 1 : vector<1x128xf32>, i32 -> vector<1x128xf32>
    %123 = arith.addf %121, %122 : vector<1x128xf32>
    %c64_i32_58 = arith.constant 64 : i32
    %124 = tpu.dynamic_rotate %123 by %c64_i32_58 dim 1 : vector<1x128xf32>, i32 -> vector<1x128xf32>
    %125 = arith.addf %123, %124 : vector<1x128xf32>
    %c8_i32_59 = arith.constant 8 : i32
    %126 = tpu.dynamic_rotate %117 by %c8_i32_59 dim 1 : vector<1x128xf32>, i32 -> vector<1x128xf32>
    %127 = arith.addf %117, %126 : vector<1x128xf32>
    %c16_i32_60 = arith.constant 16 : i32
    %128 = tpu.dynamic_rotate %127 by %c16_i32_60 dim 1 : vector<1x128xf32>, i32 -> vector<1x128xf32>
    %129 = arith.addf %127, %128 : vector<1x128xf32>
    %c32_i32_61 = arith.constant 32 : i32
    %130 = tpu.dynamic_rotate %129 by %c32_i32_61 dim 1 : vector<1x128xf32>, i32 -> vector<1x128xf32>
    %131 = arith.addf %129, %130 : vector<1x128xf32>
    %c64_i32_62 = arith.constant 64 : i32
    %132 = tpu.dynamic_rotate %131 by %c64_i32_62 dim 1 : vector<1x128xf32>, i32 -> vector<1x128xf32>
    %133 = arith.addf %131, %132 : vector<1x128xf32>
    %cst_63 = arith.constant 0.001953125 : f32
    %134 = vector.broadcast %cst_63 : f32 to vector<1x128xf32>
    %135 = arith.mulf %125, %134 : vector<1x128xf32>
    %cst_64 = arith.constant 0.001953125 : f32
    %136 = vector.broadcast %cst_64 : f32 to vector<1x128xf32>
    %137 = arith.mulf %133, %136 : vector<1x128xf32>
    %138 = arith.mulf %135, %135 : vector<1x128xf32>
    %139 = arith.subf %137, %138 : vector<1x128xf32>
    %cst_65 = arith.constant 9.99999974E-6 : f32
    %140 = vector.broadcast %cst_65 : f32 to vector<1x128xf32>
    %141 = arith.addf %139, %140 : vector<1x128xf32>
    %142 = math.rsqrt %141 : vector<1x128xf32>
    %143 = arith.mulf %111, %142 : vector<1x128xf32>
    %144 = arith.mulf %135, %143 : vector<1x128xf32>
    %145 = arith.subf %112, %144 : vector<1x128xf32>
    %146 = vector.broadcast %143 : vector<1x128xf32> to vector<32x128xf32>
    %147 = arith.mulf %110, %146 : vector<32x128xf32>
    %148 = vector.broadcast %145 : vector<1x128xf32> to vector<32x128xf32>
    %149 = arith.addf %147, %148 : vector<32x128xf32>
    %c0_66 = arith.constant 0 : index
    %c0_67 = arith.constant 0 : index
    %150 = vector.load %arg9[%c0_66, %c0_67] : memref<64x128xf32, #tpu.memory_space<vmem>>, vector<64x128xf32>
    %cst_68 = arith.constant dense<0.000000e+00> : vector<32x128xf32>
    %151 = tpu.matmul %0, %150, %cst_68 {dimension_numbers = #tpu.dot_dimension_numbers<[1], [0], [0], [1], [0, 0, 1, 1], [], []>} : vector<32x64xf32>, vector<64x128xf32>, vector<32x128xf32> -> vector<32x128xf32>
    %c0_69 = arith.constant 0 : index
    %c0_70 = arith.constant 0 : index
    %152 = vector.load %arg10[%c0_69, %c0_70] : memref<1x128xf32, #tpu.memory_space<vmem>>, vector<1x128xf32>
    %153 = vector.broadcast %152 : vector<1x128xf32> to vector<32x128xf32>
    %154 = arith.addf %151, %153 : vector<32x128xf32>
    %c0_71 = arith.constant 0 : index
    %c0_72 = arith.constant 0 : index
    %155 = vector.load %arg11[%c0_71, %c0_72] : memref<1x128xf32, #tpu.memory_space<vmem>>, vector<1x128xf32>
    %c0_73 = arith.constant 0 : index
    %c0_74 = arith.constant 0 : index
    %156 = vector.load %arg12[%c0_73, %c0_74] : memref<1x128xf32, #tpu.memory_space<vmem>>, vector<1x128xf32>
    %cst_75 = arith.constant dense<0.000000e+00> : vector<128xf32>
    %157 = vector.multi_reduction <add>, %154, %cst_75 [0] : vector<32x128xf32> to vector<128xf32>
    %158 = vector.shape_cast %157 : vector<128xf32> to vector<1x128xf32>
    %159 = arith.mulf %154, %154 : vector<32x128xf32>
    %cst_76 = arith.constant dense<0.000000e+00> : vector<128xf32>
    %160 = vector.multi_reduction <add>, %159, %cst_76 [0] : vector<32x128xf32> to vector<128xf32>
    %161 = vector.shape_cast %160 : vector<128xf32> to vector<1x128xf32>
    %c8_i32_77 = arith.constant 8 : i32
    %162 = tpu.dynamic_rotate %158 by %c8_i32_77 dim 1 : vector<1x128xf32>, i32 -> vector<1x128xf32>
    %163 = arith.addf %158, %162 : vector<1x128xf32>
    %c16_i32_78 = arith.constant 16 : i32
    %164 = tpu.dynamic_rotate %163 by %c16_i32_78 dim 1 : vector<1x128xf32>, i32 -> vector<1x128xf32>
    %165 = arith.addf %163, %164 : vector<1x128xf32>
    %c32_i32_79 = arith.constant 32 : i32
    %166 = tpu.dynamic_rotate %165 by %c32_i32_79 dim 1 : vector<1x128xf32>, i32 -> vector<1x128xf32>
    %167 = arith.addf %165, %166 : vector<1x128xf32>
    %c64_i32_80 = arith.constant 64 : i32
    %168 = tpu.dynamic_rotate %167 by %c64_i32_80 dim 1 : vector<1x128xf32>, i32 -> vector<1x128xf32>
    %169 = arith.addf %167, %168 : vector<1x128xf32>
    %c8_i32_81 = arith.constant 8 : i32
    %170 = tpu.dynamic_rotate %161 by %c8_i32_81 dim 1 : vector<1x128xf32>, i32 -> vector<1x128xf32>
    %171 = arith.addf %161, %170 : vector<1x128xf32>
    %c16_i32_82 = arith.constant 16 : i32
    %172 = tpu.dynamic_rotate %171 by %c16_i32_82 dim 1 : vector<1x128xf32>, i32 -> vector<1x128xf32>
    %173 = arith.addf %171, %172 : vector<1x128xf32>
    %c32_i32_83 = arith.constant 32 : i32
    %174 = tpu.dynamic_rotate %173 by %c32_i32_83 dim 1 : vector<1x128xf32>, i32 -> vector<1x128xf32>
    %175 = arith.addf %173, %174 : vector<1x128xf32>
    %c64_i32_84 = arith.constant 64 : i32
    %176 = tpu.dynamic_rotate %175 by %c64_i32_84 dim 1 : vector<1x128xf32>, i32 -> vector<1x128xf32>
    %177 = arith.addf %175, %176 : vector<1x128xf32>
    %cst_85 = arith.constant 0.001953125 : f32
    %178 = vector.broadcast %cst_85 : f32 to vector<1x128xf32>
    %179 = arith.mulf %169, %178 : vector<1x128xf32>
    %cst_86 = arith.constant 0.001953125 : f32
    %180 = vector.broadcast %cst_86 : f32 to vector<1x128xf32>
    %181 = arith.mulf %177, %180 : vector<1x128xf32>
    %182 = arith.mulf %179, %179 : vector<1x128xf32>
    %183 = arith.subf %181, %182 : vector<1x128xf32>
    %cst_87 = arith.constant 9.99999974E-6 : f32
    %184 = vector.broadcast %cst_87 : f32 to vector<1x128xf32>
    %185 = arith.addf %183, %184 : vector<1x128xf32>
    %186 = math.rsqrt %185 : vector<1x128xf32>
    %187 = arith.mulf %155, %186 : vector<1x128xf32>
    %188 = arith.mulf %179, %187 : vector<1x128xf32>
    %189 = arith.subf %156, %188 : vector<1x128xf32>
    %190 = vector.broadcast %187 : vector<1x128xf32> to vector<32x128xf32>
    %191 = arith.mulf %154, %190 : vector<32x128xf32>
    %192 = vector.broadcast %189 : vector<1x128xf32> to vector<32x128xf32>
    %193 = arith.addf %191, %192 : vector<32x128xf32>
    %194 = arith.addf %149, %193 : vector<32x128xf32>
    %cst_88 = arith.constant 0.000000e+00 : f32
    %195 = vector.broadcast %cst_88 : f32 to vector<32x128xf32>
    %196 = arith.maximumf %194, %195 : vector<32x128xf32>
    %c0_89 = arith.constant 0 : index
    %c0_90 = arith.constant 0 : index
    %197 = vector.load %arg13[%c0_89, %c0_90] : memref<32x128xf32, #tpu.memory_space<vmem>>, vector<32x128xf32>
    tpu.vector_store %arg13[%c0_89, %c0_90], %196 {strides = array<i32>} : memref<32x128xf32, #tpu.memory_space<vmem>>, vector<32x128xf32>,
    return
  }
}

</mosaic_0001>

<bundles_post_ra>
// kernel: tpu_custom_call.1
= control target key start
LH: loop header
LB: loop body
LE: loop exit
PB: predicated region body
PF: predicated region fallthrough
CT: control target
= control target key end

     0   :  { %18 = vsyncpa [#allocation3], 0  ;;  %s2273_s0 = inlined_call_operand.hbm [shape: f32[32,64], index: 0, kind: input, shape index: {}]   ;;  %s2274_s1 = inlined_call_operand.hbm [shape: f32[3,64,128], index: 1, kind: input, shape index: {}]   ;;  %s2275_s2 = inlined_call_operand.vmem [shape: f32[1,128], index: 2, kind: input, shape index: {}]   ;;  %s2276_s3 = inlined_call_operand.vmem [shape: f32[1,128], index: 3, kind: input, shape index: {}]   ;;  %s2277_s4 = inlined_call_operand.vmem [shape: f32[1,128], index: 4, kind: input, shape index: {}]   ;;  %s2278_s5 = inlined_call_operand.hbm [shape: f32[3,128,128], index: 5, kind: input, shape index: {}]   ;;  %s2279_s6 = inlined_call_operand.vmem [shape: f32[1,128], index: 6, kind: input, shape index: {}]   ;;  %s2280_s7 = inlined_call_operand.vmem [shape: f32[1,128], index: 7, kind: input, shape index: {}]   ;;  %s2281_s8 = inlined_call_operand.vmem [shape: f32[1,128], index: 8, kind: input, shape index: {}]   ;;  %s2282_s9 = inlined_call_operand.hbm [shape: f32[64,128], index: 9, kind: input, shape index: {}]   ;;  %s2283_s10 = inlined_call_operand.vmem [shape: f32[1,128], index: 10, kind: input, shape index: {}]   ;;  %s2284_s11 = inlined_call_operand.vmem [shape: f32[1,128], index: 11, kind: input, shape index: {}]   ;;  %s2285_s12 = inlined_call_operand.vmem [shape: f32[1,128], index: 12, kind: input, shape index: {}]   ;;  %s2286_s13 = inlined_call_operand.hbm [shape: f32[32,128], index: 13, kind: output, shape index: {}]  }
   0x1   :  { %19 = vsyncpa [#allocation6], 0 }
   0x2   :  { %20 = vsyncpa [#allocation9], 0 }
   0x3   :  { %21 = vsyncpa [#allocation4], 0  ;;  %s1869_s25 = smov [#allocation5]   ;;  %s1870_s27 = smov [#allocation2]  }
   0x4   :  { %s39_s26 = sshll.u32 %s1869_s25, 4  ;;  %s27_s28 = sshll.u32 %s1870_s27, 4  ;;  %s40_s26 = int_to_ptr.vmem [resolvable:$true] %s39_s26  ;;  %s1949_s28 = int_to_ptr.vmem [resolvable:$true] %s27_s28 }
   0x5   :  { %s1751_s14 = scalar_lea.hbm %s2274_s1, 3072 }
   0x6   :  { %p1752_p0 = scmp.ne.s32.totalorder %s2274_s1, %s1751_s14  ;;  %p1755_p1 = scmp.lt.u32.totalorder %s1751_s14, %s2274_s1 }
   0x8   :  { %p1757_p2 = pnand %p1755_p1, %p1752_p0 }
   0xa   :  { %1760 = shalt.err (!%p1757_p2)
}
   0xb   :  { %s1761_s19 = scalar_lea.vmem %s40_s26, 3072  ;;  %p1766_p4 = scmp.lt.s32.totalorder %s40_s26, %s40_s26 }
   0xc   :  { %p1762_p3 = scmp.ne.s32.totalorder %s40_s26, %s1761_s19  ;;  %p1767_p5 = scmp.lt.s32.totalorder %s1761_s19, %s1761_s19 }
   0xe   :  { %p1768_p6 = por %p1767_p5, %p1766_p4 }
  0x10   :  { %p1769_p7 = pnand %p1768_p6, %p1762_p3 }
  0x12   :  { %1772 = shalt.err (!%p1769_p7)
}
  0x13   :  { %s1871_s20 = smov 128   ;;  %s1872_s21 = smov 8  }
  0x14   :  { %45 = dma.hbm_to_vmem [thread:$0]  %s2274_s1, 3072, %s40_s26, [#allocation6], %s1871_s20, %s1871_s20, %s1872_s21  }
  0x15   :  { %s1773_s27 = scalar_lea.hbm %s2273_s0, 512 }
  0x16   :  { %p1774_p8 = scmp.ne.s32.totalorder %s2273_s0, %s1773_s27  ;;  %p1777_p9 = scmp.lt.u32.totalorder %s1773_s27, %s2273_s0 }
  0x18   :  { %p1779_p10 = pnand %p1777_p9, %p1774_p8 }
  0x1a   :  { %1782 = shalt.err (!%p1779_p10)
}
  0x1b   :  { %s1783_s16 = scalar_lea.vmem %s1949_s28, 512  ;;  %p1788_p12 = scmp.lt.s32.totalorder %s1949_s28, %s1949_s28 }
  0x1c   :  { %p1784_p11 = scmp.ne.s32.totalorder %s1949_s28, %s1783_s16  ;;  %p1789_p13 = scmp.lt.s32.totalorder %s1783_s16, %s1783_s16 }
  0x1e   :  { %p1790_p0 = por %p1789_p13, %p1788_p12 }
  0x20   :  { %p1791_p1 = pnand %p1790_p0, %p1784_p11 }
  0x22   :  { %1794 = shalt.err (!%p1791_p1)
}
  0x23   :  { %33 = dma.hbm_to_vmem [thread:$0]  %s2273_s0, 512, %s1949_s28, [#allocation3], %s1871_s20, %s1871_s20, %s1872_s21  }
  0x24   :  { %s1873_s17 = smov [#allocation7]   ;;  %s1874_s19 = smov [#allocation8]  }
  0x25   :  { %s57_s18 = sshll.u32 %s1873_s17, 4  ;;  %s75_s22 = sshll.u32 %s1874_s19, 4  ;;  %s58_s18 = int_to_ptr.vmem [resolvable:$true] %s57_s18  ;;  %s1986_s22 = int_to_ptr.vmem [resolvable:$true] %s75_s22 }
  0x26   :  { %s1795_s25 = scalar_lea.hbm %s2278_s5, 6144 }
  0x27   :  { %p1796_p2 = scmp.ne.s32.totalorder %s2278_s5, %s1795_s25  ;;  %p1799_p3 = scmp.lt.u32.totalorder %s1795_s25, %s2278_s5 }
  0x29   :  { %p1801_p4 = pnand %p1799_p3, %p1796_p2 }
  0x2b   :  { %1804 = shalt.err (!%p1801_p4)
}
  0x2c   :  { %s1805_s0 = scalar_lea.vmem %s58_s18, 6144  ;;  %p1810_p6 = scmp.lt.s32.totalorder %s58_s18, %s58_s18 }
  0x2d   :  { %p1806_p5 = scmp.ne.s32.totalorder %s58_s18, %s1805_s0  ;;  %p1811_p7 = scmp.lt.s32.totalorder %s1805_s0, %s1805_s0 }
  0x2f   :  { %p1812_p8 = por %p1811_p7, %p1810_p6 }
  0x31   :  { %p1813_p9 = pnand %p1812_p8, %p1806_p5 }
  0x33   :  { %1816 = shalt.err (!%p1813_p9)
}
  0x34   :  { %63 = dma.hbm_to_vmem [thread:$0]  %s2278_s5, 6144, %s58_s18, [#allocation6], %s1871_s20, %s1871_s20, %s1872_s21  }
  0x35   :  { %s1817_s26 = scalar_lea.hbm %s2282_s9, 1024 }
  0x36   :  { %p1818_p10 = scmp.ne.s32.totalorder %s2282_s9, %s1817_s26  ;;  %p1821_p11 = scmp.lt.u32.totalorder %s1817_s26, %s2282_s9 }
  0x38   :  { %p1823_p12 = pnand %p1821_p11, %p1818_p10 }
  0x3a   :  { %1826 = shalt.err (!%p1823_p12)
}
  0x3b   :  { %s1827_s25 = scalar_lea.vmem %s1986_s22, 1024  ;;  %p1832_p0 = scmp.lt.s32.totalorder %s1986_s22, %s1986_s22 }
  0x3c   :  { %p1828_p13 = scmp.ne.s32.totalorder %s1986_s22, %s1827_s25  ;;  %p1833_p1 = scmp.lt.s32.totalorder %s1827_s25, %s1827_s25 }
  0x3e   :  { %p1834_p2 = por %p1833_p1, %p1832_p0 }
  0x40   :  { %p1835_p3 = pnand %p1834_p2, %p1828_p13 }
  0x42   :  { %1838 = shalt.err (!%p1835_p3)
}
  0x43   :  { %81 = dma.hbm_to_vmem [thread:$0]  %s2282_s9, 1024, %s1986_s22, [#allocation9], %s1871_s20, %s1871_s20, %s1872_s21  }
  0x44   :  { %1861 = dma.done.wait [#allocation3], 512  }
  0x45   :  { %1862 = vsyncadd [#allocation3], 4294966784 }
  0x46   :  { %1863 = dma.done.wait [#allocation6], 9216  }
  0x47   :  { %1864 = vsyncadd [#allocation6], 4294958080 }
  0x48   :  { %1865 = dma.done.wait [#allocation9], 1024  }
  0x49   :  { %1866 = vsyncadd [#allocation9], 4294966272  ;;  %v166_v0 = vld [vmem:[#allocation5] sm:$0xff]  ;;  %v167_v1 = vld [vmem:[#allocation5 + $0x8] sm:$0xff]  ;;  %vm174_vm0 = vcmask 523264   ;;  %vm472_vm1 = vcmask 1040384   ;;  %v104_v47 = vlaneseq }
  0x4a   :  { %v168_v2 = vld [vmem:[#allocation5 + $0x10] sm:$0xff]  ;;  %v1575_v3 = vpack.c.bf16 %v167_v1, %v166_v0  ;;  %v169_v4 = vld [vmem:[#allocation5 + $0x18] sm:$0xff]  ;;  %v170_v5 = vld [vmem:[#allocation5 + $0x20] sm:$0xff]  ;;  %vm496_vm2 = vcmask 1046528   ;;  %s1876_s27 = smov 32   ;;  %s1877_s29 = smov 64  }
  0x4b   :  { %v1579_v6 = vpack.c.bf16 %v169_v4, %v168_v2  ;;  %v171_v7 = vld [vmem:[#allocation5 + $0x28] sm:$0xff]  ;;  %v282_v8 = vld [vmem:[#allocation5 + $0x80] sm:$0xff]  ;;  %v284_v11 = vld [vmem:[#allocation5 + $0x90] sm:$0xff]  ;;  %v2057_v58 = vshrl.u32 %v104_v47, 7 }
  0x4c   :  { %v283_v9 = vld [vmem:[#allocation5 + $0x88] sm:$0xff]  ;;  %1576 = vmatprep.subr.bf16.mxu0 %v1575_v3  ;;  %v285_v12 = vld [vmem:[#allocation5 + $0x98] sm:$0xff]  ;;  %v2023_v14 = vld [vmem:[#allocation2] sm:$0xff]  ;;  %v1583_v15 = vpack.c.bf16 %v171_v7, %v170_v5 }
  0x4d   :  { %v1591_v10 = vpack.c.bf16 %v283_v9, %v282_v8  ;;  %1578 = vmatpush3.bf16.msra.mxu0 %v1575_v3  ;;  %v1595_v13 = vpack.c.bf16 %v285_v12, %v284_v11  ;;  %v286_v16 = vld [vmem:[#allocation5 + $0xa0] sm:$0xff]  ;;  %v287_v17 = vld [vmem:[#allocation5 + $0xa8] sm:$0xff]  ;;  %v172_v18 = vld [vmem:[#allocation5 + $0x30] sm:$0xff]  ;;  %1389 = vmatprep.mubr.msk.f32.mxu0 %vm174_vm0, %v2023_v14  ;;  %v106_v0 = vadd.s32 8, %v2057_v58  ;;  %v113_v3 = vand.u32 15, %v2057_v58 }
  0x4e   :  { %1580 = vmatprep.subr.bf16.mxu0 %v1579_v6  ;;  %v173_v19 = vld [vmem:[#allocation5 + $0x38] sm:$0xff]  ;;  %v1599_v20 = vpack.c.bf16 %v287_v17, %v286_v16  ;;  %1411 = vmatprep.mubr.msk.f32.mxu1 %vm174_vm0, %v2023_v14  ;;  %v288_v21 = vld [vmem:[#allocation5 + $0xb0] sm:$0xff]  ;;  %v273_v24 = vld [vmem:[#allocation5 + $0x40] sm:$0xff]  ;;  %v107_v4 = vadd.s32 16, %v2057_v58 }
  0x4f   :  { %1592 = vmatprep.subr.bf16.mxu1 %v1591_v10  ;;  %v289_v22 = vld [vmem:[#allocation5 + $0xb8] sm:$0xff]  ;;  %v1587_v23 = vpack.c.bf16 %v173_v19, %v172_v18  ;;  %v274_v25 = vld [vmem:[#allocation5 + $0x48] sm:$0xff]  ;;  %v275_v28 = vld [vmem:[#allocation5 + $0x50] sm:$0xff]  ;;  %v120_v5 = vand.u32 15, %v106_v0  ;;  %vm2072_vm3 = vcmp.ne.s32.totalorder %v113_v3, 0 }
  0x50   :  { %1594 = vmatpush3.bf16.msra.mxu1 %v1591_v10  ;;  %v1603_v26 = vpack.c.bf16 %v289_v22, %v288_v21  ;;  %v1607_v27 = vpack.c.bf16 %v274_v25, %v273_v24  ;;  %v276_v29 = vld [vmem:[#allocation5 + $0x58] sm:$0xff]  ;;  %v2029_v30 = vld [vmem:[#allocation2 + $0x8] sm:$0xff]  ;;  %v2031_v31 = vld [vmem:[#allocation2 + $0x10] sm:$0xff]  ;;  %v127_v10 = vand.u32 15, %v107_v4 }
  0x51   :  { %1596 = vmatprep.subr.bf16.mxu1 %v1595_v13  ;;  %1582 = vmatpush3.bf16.msra.mxu0 %v1579_v6  ;;  %v1611_v32 = vpack.c.bf16 %v276_v29, %v275_v28  ;;  %v277_v33 = vld [vmem:[#allocation5 + $0x60] sm:$0xff]  ;;  %v278_v34 = vld [vmem:[#allocation5 + $0x68] sm:$0xff]  ;;  %v2037_v35 = vld [vmem:[#allocation2 + $0x18] sm:$0xff]  ;;  %v108_v6 = vadd.s32 24, %v2057_v58  ;;  %vm2076_vm4 = vcmp.ne.s32.totalorder %v120_v5, 15 }
  0x52   :  { %1584 = vmatprep.subr.bf16.mxu0 %v1583_v15  ;;  %v1615_v36 = vpack.c.bf16 %v278_v34, %v277_v33  ;;  %v279_v37 = vld [vmem:[#allocation5 + $0x70] sm:$0xff]  ;;  %v280_v38 = vld [vmem:[#allocation5 + $0x78] sm:$0xff]  ;;  %v1254_v7 = vld [vmem:[%s2275_s2] ss:$0 sm:$0xff]  ;;  %vm2084_vm5 = vcmp.ne.s32.totalorder %v127_v10, 0  ;;  %s1875_s2 = smov 16  }
  0x53   :  { %v1619_v39 = vpack.c.bf16 %v280_v38, %v279_v37  ;;  %v600_v5 = vld [vmem:[#allocation7] sm:$0xff]  ;;  %v720_v10 = vld [vmem:[#allocation7 + $0x108] sm:$0xff] }
  0x54   :  { %1598 = vmatpush3.bf16.msra.mxu1 %v1595_v13 }
  0x55   :  { %1600 = vmatprep.subr.bf16.mxu1 %v1599_v20  ;;  %1586 = vmatpush3.bf16.msra.mxu0 %v1583_v15  ;;  %v134_v15 = vand.u32 15, %v108_v6  ;;  %v601_v6 = vld [vmem:[#allocation7 + $0x8] sm:$0xff] }
  0x56   :  { %1588 = vmatprep.subr.bf16.mxu0 %v1587_v23 }
  0x57   :  { %vm2090_vm6 = vcmp.ne.s32.totalorder %v134_v15, 15  ;;  %v603_v15 = vld [vmem:[#allocation7 + $0x18] sm:$0xff] }
  0x58   :  { %1602 = vmatpush3.bf16.msra.mxu1 %v1599_v20 }
  0x59   :  { %1604 = vmatprep.subr.bf16.mxu1 %v1603_v26  ;;  %1590 = vmatpush3.bf16.msra.mxu0 %v1587_v23 }
  0x5a   :  { %1608 = vmatprep.subr.bf16.mxu0 %v1607_v27 }
  0x5c   :  { %1606 = vmatpush3.bf16.msra.mxu1 %v1603_v26  ;;  %1390 = vmatmul.mubr.msk.f32.vlgmr.msra.gmra.mrb[0].mxu0 %vm174_vm0, %v2029_v30 }
  0x5d   :  { %1610 = vmatpush3.bf16.msra.mxu0 %v1607_v27  ;;  %1392 = vmatprep.mubr.msk.f32.mxu0 %vm174_vm0, %v2031_v31 }
  0x5e   :  { %1612 = vmatprep.subr.bf16.mxu0 %v1611_v32 }
  0x5f   :  { %1412 = vmatmul.mubr.msk.f32.vlgmr.msra.gmra.mrb[0].mxu1 %vm174_vm0, %v2029_v30 }
  0x60   :  { %1414 = vmatprep.mubr.msk.f32.mxu1 %vm174_vm0, %v2031_v31  ;;  %1393 = vmatmul.mubr.msk.f32.gmra.mrb[2].mxu0 %vm174_vm0, %v2037_v35 }
  0x61   :  { %1614 = vmatpush3.bf16.msra.mxu0 %v1611_v32  ;;  %1433 = vmatprep.mubr.msk.f32.mxu0 %vm174_vm0, %v2023_v14 }
  0x62   :  { %1616 = vmatprep.subr.bf16.mxu0 %v1615_v36 }
  0x63   :  { %1415 = vmatmul.mubr.msk.f32.gmra.mrb[2].mxu1 %vm174_vm0, %v2037_v35 }
  0x65   :  { %1618 = vmatpush3.bf16.msra.mxu0 %v1615_v36 }
  0x66   :  { %1620 = vmatprep.subr.bf16.mxu0 %v1619_v39 }
  0x69   :  { %1622 = vmatpush3.bf16.msra.mxu0 %v1619_v39 }
  0x6c   :  { %1434 = vmatmul.mubr.msk.f32.vlgmr.msra.gmra.mrb[4].mxu0 %vm174_vm0, %v2029_v30 }
  0x6d   :  { %1436 = vmatprep.mubr.msk.f32.mxu0 %vm174_vm0, %v2031_v31 }
  0x70   :  { %1437 = vmatmul.mubr.msk.f32.gmra.mrb[6].mxu0 %vm174_vm0, %v2037_v35 }
 0x12f   :  { %v1391_v40 = vpop.f32.mrb[0].mxu0 }
 0x130   :  { %v474_v41 = vrot.slane %v1391_v40, 7  ;;  %v253_v42 = vpop.f32.mrb[1].mxu0 }
 0x131   :  { %v473_v43 = vrot.slane %v253_v42, 7 }
 0x132   :  { %v1413_v44 = vpop.f32.mrb[0].mxu1 }
 0x133   :  { %v498_v45 = vrot.slane %v1413_v44, 1  ;;  %v356_v46 = vpop.f32.mrb[1].mxu1  ;;  %v1394_v48 = vpop.f32.mrb[2].mxu0  ;;  %v475_v50 = vsel %vm472_vm1, %v473_v43, %v474_v41 }
 0x134   :  { %v497_v49 = vrot.slane %v356_v46, 1  ;;  %v467_v51 = vrot.slane %v1394_v48, 7  ;;  %v263_v52 = vpop.f32.mrb[3].mxu0 }
 0x135   :  { %v476_v53 = vrot.slane %v263_v52, 7 }
 0x136   :  { %v499_v54 = vsel %vm496_vm2, %v497_v49, %v498_v45  ;;  %v1416_v55 = vpop.f32.mrb[2].mxu1  ;;  %v483_v59 = vsel %vm472_vm1, %v467_v51, %v473_v43 }
 0x137   :  { %v502_v56 = vrot.slane %v1416_v55, 1  ;;  %v366_v57 = vpop.f32.mrb[3].mxu1  ;;  %v478_v61 = vsel %vm472_vm1, %v476_v53, %v467_v51  ;;  %v477_v62 = vsel %vm472_vm1, %v474_v41, %v476_v53  ;;  %v484_v18 = vsel %vm2072_vm3, %v483_v59, 0.0 }
 0x138   :  { %v500_v60 = vrot.slane %v366_v57, 1  ;;  %v486_v32 = vsel %vm2084_vm5, %v477_v62, 0.0 }
 0x139   :  { %v509_v63 = vsel %vm496_vm2, %v502_v56, %v497_v49 }
 0x13a   :  { %v501_v1 = vsel %vm496_vm2, %v498_v45, %v500_v60  ;;  %v503_v2 = vsel %vm496_vm2, %v500_v60, %v502_v56  ;;  %v513_v36 = vsel %vm2090_vm6, %v509_v63, 0.0 }
 0x13b   :  { %v511_v19 = vsel %vm2076_vm4, %v501_v1, 0.0 }
 0x13f   :  { %v1435_v8 = vpop.f32.mrb[4].mxu0 }
 0x140   :  { %v453_v12 = vadd.f32 %v1435_v8, %v1254_v7  ;;  %v447_v13 = vpop.f32.mrb[5].mxu0  ;;  %v1623_v8 = vpack.c.bf16 %v601_v6, %v600_v5  ;;  %v702_v6 = vld [vmem:[#allocation7 + $0x80] sm:$0xff] }
 0x141   :  { %v448_v16 = vadd.f32 %v1254_v7, %v447_v13  ;;  %v602_v13 = vld [vmem:[#allocation7 + $0x10] sm:$0xff] }
 0x142   :  { %v489_v17 = vadd.f32 %v475_v50, %v453_v12  ;;  %1624 = vmatprep.subr.bf16.mxu1 %v1623_v8 }
 0x143   :  { %v488_v20 = vadd.f32 %v484_v18, %v448_v16  ;;  %v1438_v21 = vpop.f32.mrb[6].mxu0  ;;  %1626 = vmatpush3.bf16.msra.mxu1 %v1623_v8  ;;  %v1627_v16 = vpack.c.bf16 %v603_v15, %v602_v13  ;;  %v722_v18 = vld [vmem:[#allocation7 + $0x118] sm:$0xff]  ;;  %v1038_v8 = vld [vmem:[#allocation8] sm:$0xff] }
 0x144   :  { %v2088_v23 = vadd.f32 %v511_v19, %v489_v17  ;;  %v463_v25 = vadd.f32 %v1438_v21, %v1254_v7  ;;  %v457_v26 = vpop.f32.mrb[7].mxu0  ;;  %v721_v17 = vld [vmem:[#allocation7 + $0x110] sm:$0xff]  ;;  %v605_v21 = vld [vmem:[#allocation7 + $0x28] sm:$0xff] }
 0x145   :  { %v2094_v27 = vadd.f32 %v499_v54, %v488_v20  ;;  %v458_v28 = vadd.f32 %v1254_v7, %v457_v26  ;;  %v719_v7 = vld [vmem:[#allocation7 + $0x100] sm:$0xff]  ;;  %v1659_v19 = vpack.c.bf16 %v722_v18, %v721_v17  ;;  %1628 = vmatprep.subr.bf16.mxu1 %v1627_v16 }
 0x146   :  { %v491_v29 = vadd.f32 %v478_v61, %v463_v25  ;;  %v530_v33 = vmul.f32 %v2088_v23, %v2088_v23  ;;  %v1655_v12 = vpack.c.bf16 %v720_v10, %v719_v7  ;;  %v604_v20 = vld [vmem:[#allocation7 + $0x20] sm:$0xff]  ;;  %v703_v7 = vld [vmem:[#allocation7 + $0x88] sm:$0xff] }
 0x147   :  { %v529_v34 = vmul.f32 %v2094_v27, %v2094_v27  ;;  %v490_v37 = vadd.f32 %v486_v32, %v458_v28  ;;  %v520_v39 = vadd.f32 %v2088_v23, %v2094_v27  ;;  %1630 = vmatpush3.bf16.msra.mxu1 %v1627_v16  ;;  %v723_v25 = vld [vmem:[#allocation7 + $0x120] sm:$0xff]  ;;  %v1631_v26 = vpack.c.bf16 %v605_v21, %v604_v20  ;;  %v724_v28 = vld [vmem:[#allocation7 + $0x128] sm:$0xff] }
 0x148   :  { %v2104_v38 = vadd.f32 %v513_v36, %v491_v29  ;;  %1656 = vmatprep.subr.bf16.mxu0 %v1655_v12  ;;  %v1663_v32 = vpack.c.bf16 %v724_v28, %v723_v25  ;;  %v607_v36 = vld [vmem:[#allocation7 + $0x38] sm:$0xff]  ;;  %v1687_v10 = vpack.c.bf16 %v703_v7, %v702_v6  ;;  %v518_v28 = vld [vmem:[%s2276_s3] sm:$0x1]  ;;  %v712_v7 = vld [vmem:[#allocation7 + $0xd0] sm:$0xff] }
 0x149   :  { %v2108_v40 = vadd.f32 %v503_v2, %v490_v37  ;;  %v533_v41 = vadd.f32 %v530_v33, %v529_v34  ;;  %1658 = vmatpush3.bf16.msra.mxu0 %v1655_v12  ;;  %1632 = vmatprep.subr.bf16.mxu1 %v1631_v26  ;;  %v606_v34 = vld [vmem:[#allocation7 + $0x30] sm:$0xff]  ;;  %v1039_v12 = vld [vmem:[#allocation8 + $0x8] sm:$0xff] }
 0x14a   :  { %v532_v44 = vmul.f32 %v2104_v38, %v2104_v38  ;;  %1660 = vmatprep.subr.bf16.mxu0 %v1659_v19  ;;  %v725_v37 = vld [vmem:[#allocation7 + $0x130] sm:$0xff]  ;;  %v1719_v13 = vpack.c.bf16 %v1039_v12, %v1038_v8  ;;  %v713_v8 = vld [vmem:[#allocation7 + $0xd8] sm:$0xff]  ;;  %v714_v12 = vld [vmem:[#allocation7 + $0xe0] sm:$0xff] }
 0x14b   :  { %v521_v42 = vadd.f32 %v520_v39, %v2108_v40  ;;  %v531_v43 = vmul.f32 %v2108_v40, %v2108_v40  ;;  %1634 = vmatpush3.bf16.msra.mxu1 %v1631_v26  ;;  %v1635_v39 = vpack.c.bf16 %v607_v36, %v606_v34 }
 0x14d   :  { %v522_v45 = vadd.f32 %v521_v42, %v2104_v38  ;;  %v534_v46 = vadd.f32 %v533_v41, %v531_v43  ;;  %1662 = vmatpush3.bf16.msra.mxu0 %v1659_v19  ;;  %v726_v41 = vld [vmem:[#allocation7 + $0x138] sm:$0xff]  ;;  %1636 = vmatprep.subr.bf16.mxu1 %v1635_v39 }
 0x14e   :  { %1664 = vmatprep.subr.bf16.mxu0 %v1663_v32  ;;  %v1667_v43 = vpack.c.bf16 %v726_v41, %v725_v37 }
 0x14f   :  { %v523_v47 = vrot.slane %v522_v45, 4  ;;  %v535_v48 = vadd.f32 %v534_v46, %v532_v44  ;;  %1638 = vmatpush3.bf16.msra.mxu1 %v1635_v39  ;;  %v609_v46 = vld [vmem:[#allocation7 + $0x48] sm:$0xff] }
 0x151   :  { %v524_v49 = vadd.f32 %v523_v47, %v522_v45  ;;  %v536_v50 = vrot.slane %v535_v48, 4  ;;  %1666 = vmatpush3.bf16.msra.mxu0 %v1663_v32  ;;  %v608_v45 = vld [vmem:[#allocation7 + $0x40] sm:$0xff] }
 0x152   :  { %1668 = vmatprep.subr.bf16.mxu0 %v1667_v43  ;;  %v727_v47 = vld [vmem:[#allocation7 + $0x140] sm:$0xff] }
 0x153   :  { %v525_v51 = vrot.slane %v524_v49, 2  ;;  %v537_v52 = vadd.f32 %v536_v50, %v535_v48  ;;  %v1639_v48 = vpack.c.bf16 %v609_v46, %v608_v45  ;;  %v704_v46 = vld [vmem:[#allocation7 + $0x90] sm:$0xff] }
 0x155   :  { %v526_v53 = vadd.f32 %v525_v51, %v524_v49  ;;  %v538_v54 = vrot.slane %v537_v52, 2  ;;  %1670 = vmatpush3.bf16.msra.mxu0 %v1667_v43  ;;  %v728_v49 = vld [vmem:[#allocation7 + $0x148] sm:$0xff]  ;;  %1640 = vmatprep.subr.bf16.mxu1 %v1639_v48  ;;  %v610_v51 = vld [vmem:[#allocation7 + $0x50] sm:$0xff] }
 0x156   :  { %v1671_v50 = vpack.c.bf16 %v728_v49, %v727_v47  ;;  %1642 = vmatpush3.bf16.msra.mxu1 %v1639_v48  ;;  %v705_v48 = vld [vmem:[#allocation7 + $0x98] sm:$0xff]  ;;  %v1040_v49 = vld [vmem:[#allocation8 + $0x10] sm:$0xff] }
 0x157   :  { %v527_v55 = vrot.slane %v526_v53, 1  ;;  %v539_v56 = vadd.f32 %v538_v54, %v537_v52  ;;  %v611_v52 = vld [vmem:[#allocation7 + $0x58] sm:$0xff] }
 0x158   :  { %1672 = vmatprep.subr.bf16.mxu0 %v1671_v50  ;;  %v1643_v54 = vpack.c.bf16 %v611_v52, %v610_v51 }
 0x159   :  { %v528_v57 = vadd.f32 %v527_v55, %v526_v53  ;;  %v540_v59 = vrot.slane %v539_v56, 1  ;;  %v729_v53 = vld [vmem:[#allocation7 + $0x150] sm:$0xff]  ;;  %1674 = vmatpush3.bf16.msra.mxu0 %v1671_v50  ;;  %v730_v55 = vld [vmem:[#allocation7 + $0x158] sm:$0xff] }
 0x15a   :  { %1644 = vmatprep.subr.bf16.mxu1 %v1643_v54  ;;  %v1041_v50 = vld [vmem:[#allocation8 + $0x18] sm:$0xff] }
 0x15b   :  { %542 = vrot.lane.b32.xlu0 %v528_v57, %s1872_s21  ;;  %v541_v60 = vadd.f32 %v540_v59, %v539_v56  ;;  %v1675_v56 = vpack.c.bf16 %v730_v55, %v729_v53  ;;  %v613_v59 = vld [vmem:[#allocation7 + $0x68] sm:$0xff]  ;;  %1646 = vmatpush3.bf16.msra.mxu1 %v1643_v54  ;;  %v1723_v55 = vpack.c.bf16 %v1041_v50, %v1040_v49 }
 0x15d   :  { %1676 = vmatprep.subr.bf16.mxu0 %v1675_v56 }
 0x15e   :  { %1678 = vmatpush3.bf16.msra.mxu0 %v1675_v56  ;;  %v707_v56 = vld [vmem:[#allocation7 + $0xa8] sm:$0xff] }
 0x15f   :  { %554 = vrot.lane.b32.xlu0 %v541_v60, %s1872_s21 }
 0x1cd   :  { %v543_v61 = vpop.permute.xlu0 %542 }
 0x1ce   :  { %v544_v62 = vadd.f32 %v543_v61, %v528_v57  ;;  %v612_v57 = vld [vmem:[#allocation7 + $0x60] sm:$0xff] }
 0x1cf   :  { %v1647_v61 = vpack.c.bf16 %v613_v59, %v612_v57  ;;  %v1042_v57 = vld [vmem:[#allocation8 + $0x20] sm:$0xff]  ;;  %v1043_v59 = vld [vmem:[#allocation8 + $0x28] sm:$0xff] }
 0x1d0   :  { %545 = vrot.lane.b32.xlu1 %v544_v62, %s1875_s2 }
 0x1d1   :  { %v555_v63 = vpop.permute.xlu0 %554  ;;  %1648 = vmatprep.subr.bf16.mxu1 %v1647_v61 }
 0x1d2   :  { %v556_v0 = vadd.f32 %v555_v63, %v541_v60  ;;  %v731_v60 = vld [vmem:[#allocation7 + $0x160] sm:$0xff]  ;;  %v614_v63 = vld [vmem:[#allocation7 + $0x70] sm:$0xff]  ;;  %1650 = vmatpush3.bf16.msra.mxu1 %v1647_v61 }
 0x1d3   :  { %v708_v61 = vld [vmem:[#allocation7 + $0xb0] sm:$0xff] }
 0x1d4   :  { %557 = vrot.lane.b32.xlu1 %v556_v0, %s1875_s2 }
 0x242   :  { %v546_v1 = vpop.permute.xlu1 %545 }
 0x243   :  { %v547_v2 = vadd.f32 %v546_v1, %v544_v62  ;;  %v732_v62 = vld [vmem:[#allocation7 + $0x168] sm:$0xff] }
 0x244   :  { %v1679_v1 = vpack.c.bf16 %v732_v62, %v731_v60  ;;  %v1727_v62 = vpack.c.bf16 %v1043_v59, %v1042_v57 }
 0x245   :  { %548 = vrot.lane.b32.xlu0 %v547_v2, %s1876_s27 }
 0x246   :  { %v558_v3 = vpop.permute.xlu1 %557  ;;  %1680 = vmatprep.subr.bf16.mxu0 %v1679_v1 }
 0x247   :  { %v559_v4 = vadd.f32 %v558_v3, %v556_v0  ;;  %v615_v0 = vld [vmem:[#allocation7 + $0x78] sm:$0xff]  ;;  %v733_v3 = vld [vmem:[#allocation7 + $0x170] sm:$0xff]  ;;  %1682 = vmatpush3.bf16.msra.mxu0 %v1679_v1 }
 0x248   :  { %v1045_v1 = vld [vmem:[#allocation8 + $0x38] sm:$0xff] }
 0x249   :  { %560 = vrot.lane.b32.xlu1 %v559_v4, %s1876_s27 }
 0x2b7   :  { %v549_v29 = vpop.permute.xlu0 %548 }
 0x2b8   :  { %v2122_v33 = vadd.f32 %v549_v29, %v547_v2  ;;  %v1651_v2 = vpack.c.bf16 %v615_v0, %v614_v63  ;;  %v2132_v29 = vsub.s32 0, %v2057_v58  ;;  %v709_v63 = vld [vmem:[#allocation7 + $0xb8] sm:$0xff]  ;;  %v1044_v0 = vld [vmem:[#allocation8 + $0x30] sm:$0xff] }
 0x2ba   :  { %551 = vrot.lane.b32.xlu0 %v2122_v33, %s1877_s29  ;;  %1652 = vmatprep.subr.bf16.mxu1 %v1651_v2 }
 0x2bb   :  { %v561_v42 = vpop.permute.xlu1 %560  ;;  %1654 = vmatpush3.bf16.msra.mxu1 %v1651_v2  ;;  %v1699_v2 = vpack.c.bf16 %v709_v63, %v708_v61 }
 0x2bc   :  { %v562_v44 = vadd.f32 %v561_v42, %v559_v4  ;;  %v734_v4 = vld [vmem:[#allocation7 + $0x178] sm:$0xff]  ;;  %1688 = vmatprep.subr.bf16.mxu1 %v1687_v10 }
 0x2bd   :  { %v1683_v5 = vpack.c.bf16 %v734_v4, %v733_v3  ;;  %v1731_v3 = vpack.c.bf16 %v1045_v1, %v1044_v0  ;;  %v710_v4 = vld [vmem:[#allocation7 + $0xc0] sm:$0xff] }
 0x2be   :  { %563 = vrot.lane.b32.xlu1 %v562_v44, %s1877_s29  ;;  %v1259_v1 = vld [vmem:[%s2279_s6] ss:$0 sm:$0xff] }
 0x2bf   :  { %1684 = vmatprep.subr.bf16.mxu0 %v1683_v5 }
 0x2c0   :  { %1686 = vmatpush3.bf16.msra.mxu0 %v1683_v5  ;;  %v711_v5 = vld [vmem:[#allocation7 + $0xc8] sm:$0xff] }
 0x2c1   :  { %1720 = vmatprep.subr.bf16.mxu0 %v1719_v13  ;;  %v1703_v6 = vpack.c.bf16 %v711_v5, %v710_v4 }
 0x32c   :  { %v552_v15 = vpop.permute.xlu0 %551 }
 0x32d   :  { %v553_v16 = vadd.f32 %v552_v15, %v2122_v33  ;;  %v519_v33 = vld [vmem:[%s2277_s4] sm:$0x1]  ;;  %v716_v15 = vld [vmem:[#allocation7 + $0xf0] sm:$0xff] }
 0x32f   :  { %v566_v17 = vmul.f32 0.001953125, %v553_v16  ;;  %v717_v16 = vld [vmem:[#allocation7 + $0xf8] sm:$0xff] }
 0x330   :  { %v564_v18 = vpop.permute.xlu1 %563 }
 0x331   :  { %v565_v19 = vadd.f32 %v564_v18, %v562_v44  ;;  %v568_v20 = vmul.f32 %v566_v17, %v566_v17 }
 0x333   :  { %v567_v21 = vmul.f32 0.001953125, %v565_v19 }
 0x335   :  { %v569_v25 = vsub.f32 %v567_v21, %v568_v20 }
 0x337   :  { %v570_v26 = vadd.f32 1e-05, %v569_v25 }
 0x339   :  { %1745 = vrsqrt.f32 %v570_v26 }
 0x343   :  { %v1746_v32 = vpop.eup %1745 }
 0x344   :  { %v572_v34 = vmul.f32 %v1746_v32, %v518_v28 }
 0x346   :  { %v573_v36 = vmul.f32 %v572_v34, %v566_v17  ;;  %v579_v37 = vrot.slane %v572_v34, %v2132_v29  ;;  %v1715_v17 = vpack.c.bf16 %v717_v16, %v716_v15 }
 0x348   :  { %v574_v39 = vsub.f32 %v519_v33, %v573_v36  ;;  %v581_v41 = vmul.f32 %v579_v37, %v2094_v27  ;;  %v582_v43 = vmul.f32 %v579_v37, %v2088_v23  ;;  %v583_v44 = vmul.f32 %v579_v37, %v2108_v40  ;;  %v706_v23 = vld [vmem:[#allocation7 + $0xa0] sm:$0xff] }
 0x349   :  { %v584_v51 = vmul.f32 %v579_v37, %v2104_v38  ;;  %v1691_v27 = vpack.c.bf16 %v705_v48, %v704_v46  ;;  %v1695_v60 = vpack.c.bf16 %v707_v56, %v706_v23  ;;  %v1260_v48 = vld [vmem:[%s2283_s10] ss:$0 sm:$0xff] }
 0x34a   :  { %v589_v42 = vrot.slane %v574_v39, %v2132_v29 }
 0x34c   :  { %v591_v58 = vadd.f32 %v589_v42, %v581_v41  ;;  %v592_v45 = vadd.f32 %v589_v42, %v582_v43  ;;  %v593_v47 = vadd.f32 %v589_v42, %v583_v44  ;;  %v594_v54 = vadd.f32 %v589_v42, %v584_v51 }
 0x34e   :  { %v595_v52 = vmax.f32 %v591_v58, 0.0  ;;  %v2143_v53 = vmax.f32 %v592_v45, 0.0  ;;  %v597_v40 = vmax.f32 %v593_v47, 0.0  ;;  %v598_v38 = vmax.f32 %v594_v54, 0.0 }
 0x350   :  { %1471 = vmatprep.mubr.f32.mxu1 %v595_v52  ;;  %1509 = vmatprep.mubr.f32.mxu0 %v595_v52 }
 0x351   :  { %1472 = vmatmul.mubr.f32.vlgmr.msra.gmra.mrb[4].mxu1 %v2143_v53  ;;  %1510 = vmatmul.mubr.f32.vlgmr.msra.gmra.mrb[8].mxu0 %v2143_v53 }
 0x352   :  { %1690 = vmatpush3.bf16.msra.mxu1 %v1687_v10  ;;  %1722 = vmatpush3.bf16.msra.mxu0 %v1719_v13  ;;  %v1707_v10 = vpack.c.bf16 %v713_v8, %v712_v7  ;;  %v715_v13 = vld [vmem:[#allocation7 + $0xe8] sm:$0xff] }
 0x353   :  { %1474 = vmatprep.mubr.f32.mxu1 %v597_v40  ;;  %1512 = vmatprep.mubr.f32.mxu0 %v597_v40 }
 0x354   :  { %1692 = vmatprep.subr.bf16.mxu1 %v1691_v27  ;;  %1724 = vmatprep.subr.bf16.mxu0 %v1723_v55 }
 0x355   :  { %1475 = vmatmul.mubr.f32.gmra.mrb[6].mxu1 %v598_v38  ;;  %1513 = vmatmul.mubr.f32.gmra.mrb[10].mxu0 %v598_v38 }
 0x356   :  { %1694 = vmatpush3.bf16.msra.mxu1 %v1691_v27  ;;  %1726 = vmatpush3.bf16.msra.mxu0 %v1723_v55 }
 0x357   :  { %1547 = vmatprep.mubr.f32.mxu1 %v595_v52  ;;  %1696 = vmatprep.subr.bf16.mxu1 %v1695_v60 }
 0x358   :  { %1728 = vmatprep.subr.bf16.mxu0 %v1727_v62  ;;  %1569 = vmatprep.mubr.msk.f32.mxu0 %vm174_vm0, %v2023_v14  ;;  %v1711_v14 = vpack.c.bf16 %v715_v13, %v714_v12 }
 0x35a   :  { %1698 = vmatpush3.bf16.msra.mxu1 %v1695_v60  ;;  %1730 = vmatpush3.bf16.msra.mxu0 %v1727_v62 }
 0x35b   :  { %1700 = vmatprep.subr.bf16.mxu1 %v1699_v2  ;;  %1732 = vmatprep.subr.bf16.mxu0 %v1731_v3 }
 0x35e   :  { %1702 = vmatpush3.bf16.msra.mxu1 %v1699_v2  ;;  %1734 = vmatpush3.bf16.msra.mxu0 %v1731_v3 }
 0x35f   :  { %1704 = vmatprep.subr.bf16.mxu1 %v1703_v6 }
 0x361   :  { %1570 = vmatmul.mubr.msk.f32.vlgmr.msra.gmra.mrb[12].mxu0 %vm174_vm0, %v2029_v30 }
 0x362   :  { %1706 = vmatpush3.bf16.msra.mxu1 %v1703_v6  ;;  %1572 = vmatprep.mubr.msk.f32.mxu0 %vm174_vm0, %v2031_v31 }
 0x363   :  { %1708 = vmatprep.subr.bf16.mxu1 %v1707_v10 }
 0x365   :  { %1573 = vmatmul.mubr.msk.f32.gmra.mrb[14].mxu0 %vm174_vm0, %v2037_v35 }
 0x366   :  { %1710 = vmatpush3.bf16.msra.mxu1 %v1707_v10 }
 0x367   :  { %1712 = vmatprep.subr.bf16.mxu1 %v1711_v14 }
 0x36a   :  { %1714 = vmatpush3.bf16.msra.mxu1 %v1711_v14 }
 0x36b   :  { %1716 = vmatprep.subr.bf16.mxu1 %v1715_v17 }
 0x36e   :  { %1718 = vmatpush3.bf16.msra.mxu1 %v1715_v17 }
 0x371   :  { %1548 = vmatmul.mubr.f32.vlgmr.msra.gmra.mrb[8].mxu1 %v2143_v53 }
 0x372   :  { %1550 = vmatprep.mubr.f32.mxu1 %v597_v40 }
 0x375   :  { %1551 = vmatmul.mubr.f32.gmra.mrb[10].mxu1 %v598_v38 }
 0x424   :  { %v1473_v30 = vpop.f32.mrb[4].mxu1  ;;  %v1511_v18 = vpop.f32.mrb[8].mxu0 }
 0x425   :  { %v918_v31 = vrot.slane %v1473_v30, 7  ;;  %v941_v19 = vrot.slane %v1511_v18, 1  ;;  %v682_v20 = vpop.f32.mrb[5].mxu1  ;;  %v801_v21 = vpop.f32.mrb[9].mxu0 }
 0x426   :  { %v917_v25 = vrot.slane %v682_v20, 7  ;;  %v940_v26 = vrot.slane %v801_v21, 1 }
 0x428   :  { %v942_v35 = vsel %vm496_vm2, %v940_v26, %v941_v19  ;;  %v1476_v28 = vpop.f32.mrb[6].mxu1  ;;  %v1514_v32 = vpop.f32.mrb[10].mxu0  ;;  %v919_v34 = vsel %vm472_vm1, %v917_v25, %v918_v31 }
 0x429   :  { %v912_v33 = vrot.slane %v1476_v28, 7  ;;  %v945_v36 = vrot.slane %v1514_v32, 1  ;;  %v692_v37 = vpop.f32.mrb[7].mxu1  ;;  %v811_v39 = vpop.f32.mrb[11].mxu0 }
 0x42a   :  { %v920_v41 = vrot.slane %v692_v37, 7  ;;  %v943_v42 = vrot.slane %v811_v39, 1 }
 0x42b   :  { %v952_v43 = vsel %vm496_vm2, %v945_v36, %v940_v26  ;;  %v927_v44 = vsel %vm472_vm1, %v912_v33, %v917_v25 }
 0x42c   :  { %v944_v58 = vsel %vm496_vm2, %v941_v19, %v943_v42  ;;  %v946_v45 = vsel %vm496_vm2, %v943_v42, %v945_v36  ;;  %v922_v46 = vsel %vm472_vm1, %v920_v41, %v912_v33  ;;  %v921_v47 = vsel %vm472_vm1, %v918_v31, %v920_v41 }
 0x42d   :  { %v928_v15 = vsel %vm2072_vm3, %v927_v44, 0.0  ;;  %v954_v16 = vsel %vm2076_vm4, %v944_v58, 0.0  ;;  %v956_v9 = vsel %vm2090_vm6, %v952_v43, 0.0  ;;  %v930_v11 = vsel %vm2084_vm5, %v921_v47, 0.0 }
 0x434   :  { %v1571_v49 = vpop.f32.mrb[12].mxu0 }
 0x435   :  { %v2167_v50 = vadd.f32 %v1571_v49, %v1260_v48  ;;  %v1119_v51 = vpop.f32.mrb[13].mxu0 }
 0x436   :  { %v2169_v52 = vadd.f32 %v1260_v48, %v1119_v51 }
 0x437   :  { %v1150_v53 = vmul.f32 %v2167_v50, %v2167_v50 }
 0x438   :  { %v1140_v54 = vadd.f32 %v2167_v50, %v2169_v52  ;;  %v1149_v27 = vmul.f32 %v2169_v52, %v2169_v52  ;;  %v1574_v55 = vpop.f32.mrb[14].mxu0 }
 0x439   :  { %v1129_v23 = vpop.f32.mrb[15].mxu0  ;;  %v2177_v40 = vadd.f32 %v1574_v55, %v1260_v48 }
 0x43a   :  { %v1153_v56 = vadd.f32 %v1150_v53, %v1149_v27  ;;  %v2179_v57 = vadd.f32 %v1260_v48, %v1129_v23 }
 0x43b   :  { %v1152_v59 = vmul.f32 %v2177_v40, %v2177_v40 }
 0x43c   :  { %v1141_v38 = vadd.f32 %v1140_v54, %v2179_v57  ;;  %v1151_v60 = vmul.f32 %v2179_v57, %v2179_v57 }
 0x43e   :  { %v1142_v61 = vadd.f32 %v1141_v38, %v2177_v40  ;;  %v1154_v62 = vadd.f32 %v1153_v56, %v1151_v60 }
 0x440   :  { %v1143_v63 = vrot.slane %v1142_v61, 4  ;;  %v1155_v0 = vadd.f32 %v1154_v62, %v1152_v59 }
 0x442   :  { %v1144_v2 = vadd.f32 %v1143_v63, %v1142_v61  ;;  %v1156_v3 = vrot.slane %v1155_v0, 4 }
 0x444   :  { %v1549_v4 = vpop.f32.mrb[8].mxu1  ;;  %v1145_v5 = vrot.slane %v1144_v2, 2  ;;  %v1157_v6 = vadd.f32 %v1156_v3, %v1155_v0 }
 0x445   :  { %v898_v7 = vadd.f32 %v1549_v4, %v1259_v1  ;;  %v892_v8 = vpop.f32.mrb[9].mxu1 }
 0x446   :  { %v893_v10 = vadd.f32 %v1259_v1, %v892_v8  ;;  %v1146_v12 = vadd.f32 %v1145_v5, %v1144_v2  ;;  %v1158_v13 = vrot.slane %v1157_v6, 2 }
 0x447   :  { %v933_v14 = vadd.f32 %v919_v34, %v898_v7 }
 0x448   :  { %v932_v17 = vadd.f32 %v928_v15, %v893_v10  ;;  %v1552_v30 = vpop.f32.mrb[10].mxu1  ;;  %v1147_v18 = vrot.slane %v1146_v12, 1  ;;  %v1159_v31 = vadd.f32 %v1158_v13, %v1157_v6 }
 0x449   :  { %v2194_v19 = vadd.f32 %v954_v16, %v933_v14  ;;  %v908_v20 = vadd.f32 %v1552_v30, %v1259_v1  ;;  %v902_v21 = vpop.f32.mrb[11].mxu1 }
 0x44a   :  { %v2196_v25 = vadd.f32 %v942_v35, %v932_v17  ;;  %v903_v26 = vadd.f32 %v1259_v1, %v902_v21  ;;  %v1148_v28 = vadd.f32 %v1147_v18, %v1146_v12  ;;  %v1160_v32 = vrot.slane %v1159_v31, 1 }
 0x44b   :  { %v935_v34 = vadd.f32 %v922_v46, %v908_v20  ;;  %v973_v33 = vmul.f32 %v2194_v19, %v2194_v19 }
 0x44c   :  { %v972_v36 = vmul.f32 %v2196_v25, %v2196_v25  ;;  %v934_v37 = vadd.f32 %v930_v11, %v903_v26  ;;  %1162 = vrot.lane.b32.xlu1 %v1148_v28, %s1872_s21  ;;  %v1161_v35 = vadd.f32 %v1160_v32, %v1159_v31  ;;  %v963_v41 = vadd.f32 %v2194_v19, %v2196_v25 }
 0x44d   :  { %v2207_v39 = vadd.f32 %v956_v9, %v935_v34 }
 0x44e   :  { %v2211_v24 = vadd.f32 %v946_v45, %v934_v37  ;;  %v976_v42 = vadd.f32 %v973_v33, %v972_v36 }
 0x44f   :  { %v975_v44 = vmul.f32 %v2207_v39, %v2207_v39 }
 0x450   :  { %v964_v22 = vadd.f32 %v963_v41, %v2211_v24  ;;  %v974_v43 = vmul.f32 %v2211_v24, %v2211_v24  ;;  %1174 = vrot.lane.b32.xlu1 %v1161_v35, %s1872_s21 }
 0x452   :  { %v965_v58 = vadd.f32 %v964_v22, %v2207_v39  ;;  %v977_v46 = vadd.f32 %v976_v42, %v974_v43 }
 0x454   :  { %v966_v47 = vrot.slane %v965_v58, 4  ;;  %v978_v48 = vadd.f32 %v977_v46, %v975_v44 }
 0x456   :  { %v967_v49 = vadd.f32 %v966_v47, %v965_v58  ;;  %v979_v51 = vrot.slane %v978_v48, 4 }
 0x458   :  { %v968_v45 = vrot.slane %v967_v49, 2  ;;  %v980_v53 = vadd.f32 %v979_v51, %v978_v48  ;;  %v1138_v48 = vld [vmem:[%s2284_s11] sm:$0x1] }
 0x45a   :  { %v969_v54 = vadd.f32 %v968_v45, %v967_v49  ;;  %v981_v27 = vrot.slane %v980_v53, 2  ;;  %v1139_v45 = vld [vmem:[%s2285_s12] sm:$0x1] }
 0x45c   :  { %v970_v55 = vrot.slane %v969_v54, 1  ;;  %v982_v23 = vadd.f32 %v981_v27, %v980_v53  ;;  %v961_v53 = vld [vmem:[%s2280_s7] sm:$0x1]  ;;  %s1878_s7 = smov [#allocation10]  }
 0x45e   :  { %v971_v56 = vadd.f32 %v970_v55, %v969_v54  ;;  %v983_v59 = vrot.slane %v982_v23, 1 }
 0x460   :  { %985 = vrot.lane.b32.xlu0 %v971_v56, %s1872_s21  ;;  %v984_v38 = vadd.f32 %v983_v59, %v982_v23 }
 0x464   :  { %997 = vrot.lane.b32.xlu0 %v984_v38, %s1872_s21 }
 0x4be   :  { %v1163_v60 = vpop.permute.xlu1 %1162 }
 0x4bf   :  { %v1164_v61 = vadd.f32 %v1163_v60, %v1148_v28 }
 0x4c1   :  { %1165 = vrot.lane.b32.xlu1 %v1164_v61, %s1875_s2 }
 0x4c2   :  { %v1175_v62 = vpop.permute.xlu1 %1174 }
 0x4c3   :  { %v1176_v63 = vadd.f32 %v1175_v62, %v1161_v35 }
 0x4c5   :  { %1177 = vrot.lane.b32.xlu1 %v1176_v63, %s1875_s2 }
 0x4d2   :  { %v986_v0 = vpop.permute.xlu0 %985 }
 0x4d3   :  { %v987_v1 = vadd.f32 %v986_v0, %v971_v56  ;;  %v962_v56 = vld [vmem:[%s2281_s8] sm:$0x1]  ;;  %s1232_s8 = sshll.u32 %s1878_s7, 4  ;;  %s1233_s8 = int_to_ptr.vmem [resolvable:$true] %s1232_s8 }
 0x4d4   :  { %s1839_s11 = scalar_lea.vmem %s1233_s8, 512  ;;  %p1844_p5 = scmp.lt.s32.totalorder %s1233_s8, %s1233_s8 }
 0x4d5   :  { %988 = vrot.lane.b32.xlu0 %v987_v1, %s1875_s2  ;;  %p1840_p4 = scmp.ne.s32.totalorder %s1233_s8, %s1839_s11  ;;  %p1845_p6 = scmp.lt.s32.totalorder %s1839_s11, %s1839_s11 }
 0x4d6   :  { %v998_v2 = vpop.permute.xlu0 %997 }
 0x4d7   :  { %v999_v3 = vadd.f32 %v998_v2, %v984_v38  ;;  %p1846_p7 = por %p1845_p6, %p1844_p5 }
 0x4d9   :  { %1000 = vrot.lane.b32.xlu0 %v999_v3, %s1875_s2  ;;  %p1847_p8 = pnand %p1846_p7, %p1840_p4 }
 0x533   :  { %v1166_v4 = vpop.permute.xlu1 %1165 }
 0x534   :  { %v1167_v5 = vadd.f32 %v1166_v4, %v1164_v61 }
 0x536   :  { %1168 = vrot.lane.b32.xlu1 %v1167_v5, %s1876_s27 }
 0x537   :  { %v1178_v6 = vpop.permute.xlu1 %1177 }
 0x538   :  { %v1179_v7 = vadd.f32 %v1178_v6, %v1176_v63 }
 0x53a   :  { %1180 = vrot.lane.b32.xlu1 %v1179_v7, %s1876_s27 }
 0x547   :  { %v989_v8 = vpop.permute.xlu0 %988 }
 0x548   :  { %v990_v10 = vadd.f32 %v989_v8, %v987_v1 }
 0x54a   :  { %991 = vrot.lane.b32.xlu0 %v990_v10, %s1876_s27 }
 0x54b   :  { %v1001_v12 = vpop.permute.xlu0 %1000 }
 0x54c   :  { %v1002_v13 = vadd.f32 %v1001_v12, %v999_v3 }
 0x54e   :  { %1003 = vrot.lane.b32.xlu0 %v1002_v13, %s1876_s27 }
 0x5a8   :  { %v1169_v14 = vpop.permute.xlu1 %1168 }
 0x5a9   :  { %v1170_v15 = vadd.f32 %v1169_v14, %v1167_v5 }
 0x5ab   :  { %1171 = vrot.lane.b32.xlu1 %v1170_v15, %s1877_s29 }
 0x5ac   :  { %v1181_v16 = vpop.permute.xlu1 %1180 }
 0x5ad   :  { %v1182_v17 = vadd.f32 %v1181_v16, %v1179_v7 }
 0x5af   :  { %1183 = vrot.lane.b32.xlu1 %v1182_v17, %s1877_s29 }
 0x5bc   :  { %v992_v30 = vpop.permute.xlu0 %991 }
 0x5bd   :  { %v993_v18 = vadd.f32 %v992_v30, %v990_v10 }
 0x5bf   :  { %994 = vrot.lane.b32.xlu0 %v993_v18, %s1877_s29 }
 0x5c0   :  { %v1004_v31 = vpop.permute.xlu0 %1003 }
 0x5c1   :  { %v1005_v20 = vadd.f32 %v1004_v31, %v1002_v13 }
 0x5c3   :  { %1006 = vrot.lane.b32.xlu0 %v1005_v20, %s1877_s29 }
 0x61d   :  { %v1172_v21 = vpop.permute.xlu1 %1171 }
 0x61e   :  { %v1173_v26 = vadd.f32 %v1172_v21, %v1170_v15 }
 0x620   :  { %v1186_v34 = vmul.f32 0.001953125, %v1173_v26 }
 0x621   :  { %v1184_v28 = vpop.permute.xlu1 %1183 }
 0x622   :  { %v1185_v32 = vadd.f32 %v1184_v28, %v1182_v17  ;;  %v1188_v11 = vmul.f32 %v1186_v34, %v1186_v34 }
 0x624   :  { %v1187_v9 = vmul.f32 0.001953125, %v1185_v32 }
 0x626   :  { %v1189_v33 = vsub.f32 %v1187_v9, %v1188_v11 }
 0x628   :  { %v1190_v36 = vadd.f32 1e-05, %v1189_v33 }
 0x62a   :  { %1747 = vrsqrt.f32 %v1190_v36 }
 0x631   :  { %v995_v37 = vpop.permute.xlu0 %994 }
 0x632   :  { %v996_v35 = vadd.f32 %v995_v37, %v993_v18 }
 0x634   :  { %v1009_v41 = vmul.f32 0.001953125, %v996_v35  ;;  %v1748_v47 = vpop.eup %1747 }
 0x635   :  { %v1007_v42 = vpop.permute.xlu0 %1006  ;;  %v1192_v49 = vmul.f32 %v1748_v47, %v1138_v48 }
 0x636   :  { %v1008_v22 = vadd.f32 %v1007_v42, %v1005_v20  ;;  %v1011_v43 = vmul.f32 %v1009_v41, %v1009_v41 }
 0x637   :  { %v1193_v51 = vmul.f32 %v1192_v49, %v1186_v34  ;;  %v1199_v55 = vrot.slane %v1192_v49, %v2132_v29 }
 0x638   :  { %v1010_v44 = vmul.f32 0.001953125, %v1008_v22 }
 0x639   :  { %v1194_v27 = vsub.f32 %v1139_v45, %v1193_v51  ;;  %v1201_v62 = vmul.f32 %v1199_v55, %v2169_v52  ;;  %v1202_v0 = vmul.f32 %v1199_v55, %v2167_v50  ;;  %v1203_v1 = vmul.f32 %v1199_v55, %v2179_v57 }
 0x63a   :  { %v1012_v58 = vsub.f32 %v1010_v44, %v1011_v43  ;;  %v1204_v2 = vmul.f32 %v1199_v55, %v2177_v40 }
 0x63b   :  { %v1209_v60 = vrot.slane %v1194_v27, %v2132_v29 }
 0x63c   :  { %v1013_v46 = vadd.f32 1e-05, %v1012_v58 }
 0x63d   :  { %v1211_v7 = vadd.f32 %v1209_v60, %v1201_v62  ;;  %v1212_v8 = vadd.f32 %v1209_v60, %v1202_v0  ;;  %v1213_v10 = vadd.f32 %v1209_v60, %v1203_v1  ;;  %v1214_v52 = vadd.f32 %v1209_v60, %v1204_v2 }
 0x63e   :  { %1749 = vrsqrt.f32 %v1013_v46 }
 0x648   :  { %v1750_v54 = vpop.eup %1749 }
 0x649   :  { %v1015_v23 = vmul.f32 %v1750_v54, %v961_v53 }
 0x64b   :  { %v1016_v59 = vmul.f32 %v1015_v23, %v1009_v41  ;;  %v1022_v38 = vrot.slane %v1015_v23, %v2132_v29 }
 0x64d   :  { %v1017_v61 = vsub.f32 %v962_v56, %v1016_v59  ;;  %v1024_v63 = vmul.f32 %v1022_v38, %v2196_v25  ;;  %v1025_v3 = vmul.f32 %v1022_v38, %v2194_v19  ;;  %v1026_v4 = vmul.f32 %v1022_v38, %v2211_v24 }
 0x64e   :  { %v1027_v5 = vmul.f32 %v1022_v38, %v2207_v39 }
 0x64f   :  { %v1032_v6 = vrot.slane %v1017_v61, %v2132_v29 }
 0x651   :  { %v1034_v12 = vadd.f32 %v1032_v6, %v1024_v63  ;;  %v1035_v25 = vadd.f32 %v1032_v6, %v1025_v3  ;;  %v1036_v13 = vadd.f32 %v1032_v6, %v1026_v4  ;;  %v1037_v50 = vadd.f32 %v1032_v6, %v1027_v5 }
 0x653   :  { %v1215_v57 = vadd.f32 %v1211_v7, %v1034_v12  ;;  %v1216_v40 = vadd.f32 %v1212_v8, %v1035_v25  ;;  %v1217_v14 = vadd.f32 %v1213_v10, %v1036_v13  ;;  %v1218_v19 = vadd.f32 %v1214_v52, %v1037_v50 }
 0x655   :  { %v1219_v15 = vmax.f32 %v1215_v57, 0.0  ;;  %v1220_v24 = vmax.f32 %v1216_v40, 0.0  ;;  %v1221_v16 = vmax.f32 %v1217_v14, 0.0  ;;  %v1222_v39 = vmax.f32 %v1218_v19, 0.0 }
 0x657   :  { %1223 = vst [vmem:[#allocation10] sm:$0xff] %v1219_v15  ;;  %1224 = vst [vmem:[#allocation10 + $0x8] sm:$0xff] %v1220_v24 }
 0x658   :  { %1225 = vst [vmem:[#allocation10 + $0x10] sm:$0xff] %v1221_v16  ;;  %1226 = vst [vmem:[#allocation10 + $0x18] sm:$0xff] %v1222_v39 }
 0x659   :  { %1850 = shalt.err (!%p1847_p8)
}
 0x65a   :  { %s1851_s5 = scalar_lea.hbm %s2286_s13, 512 }
 0x65b   :  { %p1852_p9 = scmp.ne.s32.totalorder %s2286_s13, %s1851_s5  ;;  %p1855_p10 = scmp.lt.u32.totalorder %s1851_s5, %s2286_s13 }
 0x65d   :  { %p1857_p11 = pnand %p1855_p10, %p1852_p9 }
 0x65f   :  { %1860 = shalt.err (!%p1857_p11)
}
 0x660   :  { %1238 = dma.vmem_to_hbm [thread:$0]  %s1233_s8, 512, %s2286_s13, [#allocation4], %s1871_s20, %s1871_s20, %s1872_s21  }
 0x661   :  { %1867 = dma.done.wait [#allocation4], 512  }
 0x662   :  { %1868 = vsyncadd [#allocation4], 4294966784 }
 0x663   :  { %1242 = vsyncpa [#allocation3], 1 }
 0x664   :  { %1243 = vsyncpa [#allocation6], 1 }
 0x665   :  { %1244 = vsyncpa [#allocation9], 1 }
 0x666   :  { %1245 = vsyncpa [#allocation4], 1 }

</bundles_post_ra>
